<compile_context>
chip_gen: v7x
topology: tpu7x:2x2x1
jax: 0.10.0
libtpu: 0.0.40
codegen_flags: <defaults>
</compile_context>

<pallas_src>
from functools import partial

import jax
import jax.numpy as jnp
from jax import lax
from jax.experimental import pallas as pl
from jax.experimental.pallas import tpu as pltpu

EPS = 1e-4  # BatchNorm eps in the reference module


def _silu(x):
    return x * jax.nn.sigmoid(x)


def _round_up(v, m):
    return ((v + m - 1) // m) * m


def _pick_row_tile(h, target=128):
    best = 1
    for d in range(1, h + 1):
        if h % d == 0 and d <= target:
            best = d
    return best


# ---------------- fused Pallas kernel ----------------

def _make_fused_kernel(H, W, TH, add_residual):
    """Fused Bottleneck tile kernel.

    One grid step processes a (TH+2)-row window (1-row halo) of the spatially
    padded, channels-last input held in VMEM:
      cv1 (1x1 conv as channel matmul, BN folded) -> SiLU ->
      cv2 (3x3 conv as 9 shifted matmuls, BN folded) -> SiLU -> (+ shortcut).
    """

    def kernel(xw_ref, w1_ref, b1_ref, w2_ref, b2_ref, o_ref):
        t = pl.program_id(1)                       # row-tile index
        xw = xw_ref[0]                             # (TH+2, Wp, C1p)
        thp, wp, c1p = xw.shape

        # ---- cv1: 1x1 conv as matmul over channels (BN scale folded in w1) --
        x2d = xw.reshape(thp * wp, c1p)
        y2d = jnp.dot(x2d, w1_ref[...], preferred_element_type=jnp.float32)
        y2d = _silu(y2d + b1_ref[...])             # bias = folded BN shift
        y3 = y2d.reshape(thp, wp, -1)

        # Positions that correspond to cv2's zero padding of the cv1 output
        # (spatial halo / alignment-pad columns) must contribute exactly 0.
        g = lax.broadcasted_iota(jnp.int32, (thp, wp, 1), 0) + t * TH
        c = lax.broadcasted_iota(jnp.int32, (thp, wp, 1), 1)
        valid = (g >= 1) & (g <= H) & (c >= 1) & (c <= W)
        y3 = jnp.where(valid, y3, 0.0).astype(w2_ref.dtype)

        # ---- cv2: 3x3 conv = 9 accumulated matmuls over shifted VMEM slices -
        c2p = o_ref.shape[-1]
        acc = jnp.zeros((TH * W, c2p), jnp.float32)
        for ky in range(3):
            for kx in range(3):
                tap = y3[ky:ky + TH, kx:kx + W, :].reshape(TH * W, -1)
                acc = acc + jnp.dot(tap, w2_ref[ky * 3 + kx],
                                    preferred_element_type=jnp.float32)
        z = _silu(acc + b2_ref[...])

        if add_residual:                           # shortcut: x + cv2(cv1(x))
            resid = xw[1:TH + 1, 1:W + 1, :].astype(jnp.float32)
            z = z + resid.reshape(TH * W, -1)

        # single lane-dense store per tile (c2p is a multiple of 128)
        o_ref[0] = z.reshape(TH, W, c2p).astype(o_ref.dtype)

    return kernel


# ---------------- wrappers ----------------

def bottleneck_forward_nhwc(x, p, *, row_tile=None, use_bf16=False):
    """Bottleneck(c1, c2, shortcut=True, g=1, e=0.5) on NHWC input -> NHWC."""
    N, H, W, C1 = x.shape
    w1, w2 = p["w1"], p["w2"]
    C_, C2 = w1.shape[0], w2.shape[0]
    assert w1.shape[1] == C1 and w2.shape[1] == C_
    assert W % 8 == 0, "kernel assumes W is a multiple of 8 (sublane-aligned taps)"
    add = (C1 == C2)                               # module's shortcut condition

    TH = _pick_row_tile(H, 128) if row_tile is None else row_tile
    assert H % TH == 0, "row_tile must divide H"
    nT = H // TH
    Wp = _round_up(W + 2, 8)                       # 1-col halo + sublane alignment

    cdt = jnp.bfloat16 if use_bf16 else jnp.float32
    C1p = _round_up(C1, 128)
    C_p = _round_up(C_, 128)
    C2p = _round_up(C2, 128)

    # --- fold eval-mode BatchNorm into weights / a per-channel bias ---
    s1 = p["g1"] / jnp.sqrt(p["rv1"] + EPS)
    b1f = p["b1"] - p["rm1"] * s1
    w1m = w1[:, :, 0, 0].T * s1[None, :]                             # (C1, C_)
    s2 = p["g2"] / jnp.sqrt(p["rv2"] + EPS)
    b2f = p["b2"] - p["rm2"] * s2
    w2m = (jnp.transpose(w2, (2, 3, 1, 0)) * s2).reshape(9, C_, C2)  # (9, C_, C2)

    # --- pad channel dims to multiples of 128 (lane-dense, full MXU columns) ---
    w1m = jnp.pad(w1m, ((0, C1p - C1), (0, C_p - C_))).astype(cdt)
    w2m = jnp.pad(w2m, ((0, 0), (0, C_p - C_), (0, C2p - C2))).astype(cdt)
    b1f = jnp.pad(b1f, (0, C_p - C_)).reshape(1, C_p).astype(jnp.float32)
    b2f = jnp.pad(b2f, (0, C2p - C2)).reshape(1, C2p).astype(jnp.float32)

    # --- overlapping row windows with a 1-row halo (no 9x im2col in HBM) ---
    xc = jnp.pad(x, ((0, 0), (0, 0), (0, 0), (0, C1p - C1)))
    xp = jnp.pad(xc, ((0, 0), (1, 1), (1, Wp - W - 1), (0, 0)))
    xw = jnp.stack([xp[:, t * TH:t * TH + TH + 2] for t in range(nT)], axis=1)
    xw = xw.reshape(N * nT, TH + 2, Wp, C1p).astype(cdt)

    kernel = _make_fused_kernel(H, W, TH, add)
    out = pl.pallas_call(
        kernel,
        out_shape=jax.ShapeDtypeStruct((N, H, W, C2p), jnp.float32),
        grid=(N, nT),
        in_specs=[
            pl.BlockSpec((1, TH + 2, Wp, C1p), lambda n, t: (n * nT + t, 0, 0, 0)),
            pl.BlockSpec((C1p, C_p), lambda n, t: (0, 0)),
            pl.BlockSpec((1, C_p), lambda n, t: (0, 0)),
            pl.BlockSpec((9, C_p, C2p), lambda n, t: (0, 0, 0)),
            pl.BlockSpec((1, C2p), lambda n, t: (0, 0)),
        ],
        out_specs=pl.BlockSpec((1, TH, W, C2p), lambda n, t: (n, t, 0, 0)),
        compiler_params=pltpu.CompilerParams(
            dimension_semantics=("parallel", "parallel"),
            vmem_limit_bytes=32 * 1024 * 1024),
    )(xw, w1m, b1f, w2m, b2f)

    return out[..., :C2]


@partial(jax.jit, static_argnames=("row_tile", "use_bf16"))
def bottleneck_forward(x_nchw, p, *, row_tile=None, use_bf16=False):
    # NOTE: a full CSPDarknet stack would keep activations NHWC between blocks;
    # these transposes exist only for parity with the PyTorch NCHW interface.
    x = jnp.transpose(x_nchw, (0, 2, 3, 1))
    y = bottleneck_forward_nhwc(x, p, row_tile=row_tile, use_bf16=use_bf16)
    return jnp.transpose(y, (0, 3, 1, 2))


# ---------------- pure-JAX reference for validation ----------------

def _ref_forward(x, p):
    def conv(x, w, pad):
        return lax.conv_general_dilated(
            x, w, (1, 1), [(pad, pad), (pad, pad)],
            dimension_numbers=("NCHW", "OIHW", "NCHW"))

    def bn(y, g, b, rm, rv):
        sh = (1, -1, 1, 1)
        return (y - rm.reshape(sh)) / jnp.sqrt(rv.reshape(sh) + EPS) * g.reshape(sh) + b.reshape(sh)

    y = conv(x, p["w1"], 0)
    y = bn(y, p["g1"], p["b1"], p["rm1"], p["rv1"])
    y = y * jax.nn.sigmoid(y)
    z = conv(y, p["w2"], 1)
    z = bn(z, p["g2"], p["b2"], p["rm2"], p["rv2"])
    z = z * jax.nn.sigmoid(z)
    return x + z


# ---------------- deterministic parameter init ----------------

def make_params(key, c1, c2, e=0.5):
    c_ = int(c2 * e)
    ks = jax.random.split(key, 10)
    return {
        "w1": jax.random.normal(ks[0], (c_, c1, 1, 1), jnp.float32) * 0.3,
        "g1": 0.5 + jax.random.uniform(ks[1], (c_,), jnp.float32),
        "b1": jax.random.normal(ks[2], (c_,), jnp.float32) * 0.1,
        "rm1": jax.random.normal(ks[3], (c_,), jnp.float32) * 0.1,
        "rv1": 0.5 + jax.random.uniform(ks[4], (c_,), jnp.float32),
        "w2": jax.random.normal(ks[5], (c2, c_, 3, 3), jnp.float32) * 0.2,
        "g2": 0.5 + jax.random.uniform(ks[6], (c2,), jnp.float32),
        "b2": jax.random.normal(ks[7], (c2,), jnp.float32) * 0.1,
        "rm2": jax.random.normal(ks[8], (c2,), jnp.float32) * 0.1,
        "rv2": 0.5 + jax.random.uniform(ks[9], (c2,), jnp.float32),
    }


if __name__ == "__main__":
    key = jax.random.PRNGKey(0)
    kx, kp = jax.random.split(key)

    N, C, H, W = 2, 4, 16, 16                     # Bottleneck(c1=4, c2=4)
    x = jax.random.normal(kx, (N, C, H, W), jnp.float32)
    params = make_params(kp, C, C, e=0.5)

    ref = jax.block_until_ready(_ref_forward(x, params))

    # f32 path, 2 spatial row tiles per image (exercises the halo / masking).
    out = jax.block_until_ready(bottleneck_forward(x, params, row_tile=8))
    assert out.shape == (N, C, H, W)
    assert jnp.allclose(out, ref, atol=2e-4, rtol=2e-4), "f32 tiled mismatch"

    # f32 path, auto tile selection (single tile per image).
    out_1t = jax.block_until_ready(bottleneck_forward(x, params))
    assert jnp.allclose(out_1t, ref, atol=2e-4, rtol=2e-4), "f32 auto-tile mismatch"

    # bf16 matmul operands (f32 accumulation) -- looser tolerance.
    out_bf16 = jax.block_until_ready(
        bottleneck_forward(x, params, row_tile=8, use_bf16=True))
    assert jnp.allclose(out_bf16, ref, atol=1e-1, rtol=1e-1), "bf16 mismatch"

    print("KERNEL_OK")
</pallas_src>

<mosaic_0001>
module attributes {stable_mosaic.version = 11 : i64} {
  func.func @kernel(%arg0: i32, %arg1: i32, %arg2: memref<1x10x24x128xf32, #tpu.memory_space<vmem>>, %arg3: memref<128x128xf32, #tpu.memory_space<vmem>>, %arg4: memref<1x128xf32, #tpu.memory_space<vmem>>, %arg5: memref<9x128x128xf32, #tpu.memory_space<vmem>>, %arg6: memref<1x128xf32, #tpu.memory_space<vmem>>, %arg7: memref<1x8x16x128xf32, #tpu.memory_space<vmem>>) attributes {dimension_semantics = [#tpu.dimension_semantics<parallel>, #tpu.dimension_semantics<parallel>], iteration_bounds = array<i64: 2, 2>, scalar_prefetch = 0 : i64, scratch_operands = 0 : i64, tpu.core_type = #tpu.core_type<tc>, window_params = [{transform_indices = @transform_0, window_bounds = array<i64: 1, 10, 24, 128>}, {pipeline_mode = #tpu.pipeline_mode<synchronous>, transform_indices = @transform_1, window_bounds = array<i64: 128, 128>}, {pipeline_mode = #tpu.pipeline_mode<synchronous>, transform_indices = @transform_2, window_bounds = array<i64: 1, 128>}, {pipeline_mode = #tpu.pipeline_mode<synchronous>, transform_indices = @transform_3, window_bounds = array<i64: 9, 128, 128>}, {pipeline_mode = #tpu.pipeline_mode<synchronous>, transform_indices = @transform_4, window_bounds = array<i64: 1, 128>}, {transform_indices = @transform_5, window_bounds = array<i64: 1, 8, 16, 128>}]} {
    %c0 = arith.constant 0 : index
    %c0_0 = arith.constant 0 : index
    %c0_1 = arith.constant 0 : index
    %c0_2 = arith.constant 0 : index
    %0 = vector.load %arg2[%c0, %c0_0, %c0_1, %c0_2] : memref<1x10x24x128xf32, #tpu.memory_space<vmem>>, vector<1x10x24x128xf32>
    %1 = vector.shape_cast %0 : vector<1x10x24x128xf32> to vector<10x24x128xf32>
    %2 = vector.shape_cast %1 : vector<10x24x128xf32> to vector<240x128xf32>
    %c0_3 = arith.constant 0 : index
    %c0_4 = arith.constant 0 : index
    %3 = vector.load %arg3[%c0_3, %c0_4] : memref<128x128xf32, #tpu.memory_space<vmem>>, vector<128x128xf32>
    %cst = arith.constant dense<0.000000e+00> : vector<240x128xf32>
    %4 = tpu.matmul %2, %3, %cst {dimension_numbers = #tpu.dot_dimension_numbers<[1], [0], [0], [1], [0, 0, 1, 1], [], []>} : vector<240x128xf32>, vector<128x128xf32>, vector<240x128xf32> -> vector<240x128xf32>
    %c0_5 = arith.constant 0 : index
    %c0_6 = arith.constant 0 : index
    %5 = vector.load %arg4[%c0_5, %c0_6] : memref<1x128xf32, #tpu.memory_space<vmem>>, vector<1x128xf32>
    %6 = vector.broadcast %5 : vector<1x128xf32> to vector<240x128xf32>
    %7 = arith.addf %4, %6 : vector<240x128xf32>
    %8 = arith.negf %7 : vector<240x128xf32>
    %9 = math.exp %8 : vector<240x128xf32>
    %cst_7 = arith.constant 1.000000e+00 : f32
    %10 = vector.broadcast %cst_7 : f32 to vector<240x128xf32>
    %11 = arith.addf %10, %9 : vector<240x128xf32>
    %12 = arith.divf %10, %11 : vector<240x128xf32>
    %13 = arith.mulf %7, %12 : vector<240x128xf32>
    %14 = vector.shape_cast %13 : vector<240x128xf32> to vector<10x24x128xf32>
    %15 = tpu.iota {dimensions = array<i32: 0>} : vector<10x24x1xi32>
    %c8_i32 = arith.constant 8 : i32
    %16 = arith.muli %arg1, %c8_i32 : i32
    %17 = vector.broadcast %16 : i32 to vector<10x24x1xi32>
    %18 = arith.addi %15, %17 : vector<10x24x1xi32>
    %19 = tpu.iota {dimensions = array<i32: 1>} : vector<10x24x1xi32>
    %c1_i32 = arith.constant 1 : i32
    %20 = vector.broadcast %c1_i32 : i32 to vector<10x24x1xi32>
    %21 = arith.cmpi sge, %18, %20 : vector<10x24x1xi32>
    %c16_i32 = arith.constant 16 : i32
    %22 = vector.broadcast %c16_i32 : i32 to vector<10x24x1xi32>
    %23 = arith.cmpi sle, %18, %22 : vector<10x24x1xi32>
    %24 = arith.andi %21, %23 : vector<10x24x1xi1>
    %c1_i32_8 = arith.constant 1 : i32
    %25 = vector.broadcast %c1_i32_8 : i32 to vector<10x24x1xi32>
    %26 = arith.cmpi sge, %19, %25 : vector<10x24x1xi32>
    %27 = arith.andi %24, %26 : vector<10x24x1xi1>
    %c16_i32_9 = arith.constant 16 : i32
    %28 = vector.broadcast %c16_i32_9 : i32 to vector<10x24x1xi32>
    %29 = arith.cmpi sle, %19, %28 : vector<10x24x1xi32>
    %30 = arith.andi %27, %29 : vector<10x24x1xi1>
    %cst_10 = arith.constant 0.000000e+00 : f32
    %31 = vector.shape_cast %30 : vector<10x24x1xi1> to vector<10x24x1xi1>
    %32 = vector.broadcast %31 : vector<10x24x1xi1> to vector<10x24x128xi1>
    %33 = vector.broadcast %cst_10 : f32 to vector<10x24x128xf32>
    %34 = arith.select %32, %14, %33 : vector<10x24x128xi1>, vector<10x24x128xf32>
    %cst_11 = arith.constant 0.000000e+00 : f32
    %35 = vector.broadcast %cst_11 : f32 to vector<128x128xf32>
    %36 = vector.extract_strided_slice %34 {offsets = [0, 0, 0], sizes = [8, 16, 128], strides = [1, 1, 1]} : vector<10x24x128xf32> to vector<8x16x128xf32>
    %37 = vector.shape_cast %36 : vector<8x16x128xf32> to vector<128x128xf32>
    %c0_12 = arith.constant 0 : index
    %c0_13 = arith.constant 0 : index
    %c0_14 = arith.constant 0 : index
    %38 = vector.load %arg5[%c0_12, %c0_13, %c0_14] : memref<9x128x128xf32, #tpu.memory_space<vmem>>, vector<1x128x128xf32>
    %39 = vector.shape_cast %38 : vector<1x128x128xf32> to vector<128x128xf32>
    %cst_15 = arith.constant dense<0.000000e+00> : vector<128x128xf32>
    %40 = tpu.matmul %37, %39, %cst_15 {dimension_numbers = #tpu.dot_dimension_numbers<[1], [0], [0], [1], [0, 0, 1, 1], [], []>} : vector<128x128xf32>, vector<128x128xf32>, vector<128x128xf32> -> vector<128x128xf32>
    %41 = arith.addf %35, %40 : vector<128x128xf32>
    %42 = vector.extract_strided_slice %34 {offsets = [0, 1, 0], sizes = [8, 16, 128], strides = [1, 1, 1]} : vector<10x24x128xf32> to vector<8x16x128xf32>
    %43 = vector.shape_cast %42 : vector<8x16x128xf32> to vector<128x128xf32>
    %c1 = arith.constant 1 : index
    %c0_16 = arith.constant 0 : index
    %c0_17 = arith.constant 0 : index
    %44 = vector.load %arg5[%c1, %c0_16, %c0_17] : memref<9x128x128xf32, #tpu.memory_space<vmem>>, vector<1x128x128xf32>
    %45 = vector.shape_cast %44 : vector<1x128x128xf32> to vector<128x128xf32>
    %cst_18 = arith.constant dense<0.000000e+00> : vector<128x128xf32>
    %46 = tpu.matmul %43, %45, %cst_18 {dimension_numbers = #tpu.dot_dimension_numbers<[1], [0], [0], [1], [0, 0, 1, 1], [], []>} : vector<128x128xf32>, vector<128x128xf32>, vector<128x128xf32> -> vector<128x128xf32>
    %47 = arith.addf %41, %46 : vector<128x128xf32>
    %48 = vector.extract_strided_slice %34 {offsets = [0, 2, 0], sizes = [8, 16, 128], strides = [1, 1, 1]} : vector<10x24x128xf32> to vector<8x16x128xf32>
    %49 = vector.shape_cast %48 : vector<8x16x128xf32> to vector<128x128xf32>
    %c2 = arith.constant 2 : index
    %c0_19 = arith.constant 0 : index
    %c0_20 = arith.constant 0 : index
    %50 = vector.load %arg5[%c2, %c0_19, %c0_20] : memref<9x128x128xf32, #tpu.memory_space<vmem>>, vector<1x128x128xf32>
    %51 = vector.shape_cast %50 : vector<1x128x128xf32> to vector<128x128xf32>
    %cst_21 = arith.constant dense<0.000000e+00> : vector<128x128xf32>
    %52 = tpu.matmul %49, %51, %cst_21 {dimension_numbers = #tpu.dot_dimension_numbers<[1], [0], [0], [1], [0, 0, 1, 1], [], []>} : vector<128x128xf32>, vector<128x128xf32>, vector<128x128xf32> -> vector<128x128xf32>
    %53 = arith.addf %47, %52 : vector<128x128xf32>
    %54 = vector.extract_strided_slice %34 {offsets = [1, 0, 0], sizes = [8, 16, 128], strides = [1, 1, 1]} : vector<10x24x128xf32> to vector<8x16x128xf32>
    %55 = vector.shape_cast %54 : vector<8x16x128xf32> to vector<128x128xf32>
    %c3 = arith.constant 3 : index
    %c0_22 = arith.constant 0 : index
    %c0_23 = arith.constant 0 : index
    %56 = vector.load %arg5[%c3, %c0_22, %c0_23] : memref<9x128x128xf32, #tpu.memory_space<vmem>>, vector<1x128x128xf32>
    %57 = vector.shape_cast %56 : vector<1x128x128xf32> to vector<128x128xf32>
    %cst_24 = arith.constant dense<0.000000e+00> : vector<128x128xf32>
    %58 = tpu.matmul %55, %57, %cst_24 {dimension_numbers = #tpu.dot_dimension_numbers<[1], [0], [0], [1], [0, 0, 1, 1], [], []>} : vector<128x128xf32>, vector<128x128xf32>, vector<128x128xf32> -> vector<128x128xf32>
    %59 = arith.addf %53, %58 : vector<128x128xf32>
    %60 = vector.extract_strided_slice %34 {offsets = [1, 1, 0], sizes = [8, 16, 128], strides = [1, 1, 1]} : vector<10x24x128xf32> to vector<8x16x128xf32>
    %61 = vector.shape_cast %60 : vector<8x16x128xf32> to vector<128x128xf32>
    %c4 = arith.constant 4 : index
    %c0_25 = arith.constant 0 : index
    %c0_26 = arith.constant 0 : index
    %62 = vector.load %arg5[%c4, %c0_25, %c0_26] : memref<9x128x128xf32, #tpu.memory_space<vmem>>, vector<1x128x128xf32>
    %63 = vector.shape_cast %62 : vector<1x128x128xf32> to vector<128x128xf32>
    %cst_27 = arith.constant dense<0.000000e+00> : vector<128x128xf32>
    %64 = tpu.matmul %61, %63, %cst_27 {dimension_numbers = #tpu.dot_dimension_numbers<[1], [0], [0], [1], [0, 0, 1, 1], [], []>} : vector<128x128xf32>, vector<128x128xf32>, vector<128x128xf32> -> vector<128x128xf32>
    %65 = arith.addf %59, %64 : vector<128x128xf32>
    %66 = vector.extract_strided_slice %34 {offsets = [1, 2, 0], sizes = [8, 16, 128], strides = [1, 1, 1]} : vector<10x24x128xf32> to vector<8x16x128xf32>
    %67 = vector.shape_cast %66 : vector<8x16x128xf32> to vector<128x128xf32>
    %c5 = arith.constant 5 : index
    %c0_28 = arith.constant 0 : index
    %c0_29 = arith.constant 0 : index
    %68 = vector.load %arg5[%c5, %c0_28, %c0_29] : memref<9x128x128xf32, #tpu.memory_space<vmem>>, vector<1x128x128xf32>
    %69 = vector.shape_cast %68 : vector<1x128x128xf32> to vector<128x128xf32>
    %cst_30 = arith.constant dense<0.000000e+00> : vector<128x128xf32>
    %70 = tpu.matmul %67, %69, %cst_30 {dimension_numbers = #tpu.dot_dimension_numbers<[1], [0], [0], [1], [0, 0, 1, 1], [], []>} : vector<128x128xf32>, vector<128x128xf32>, vector<128x128xf32> -> vector<128x128xf32>
    %71 = arith.addf %65, %70 : vector<128x128xf32>
    %72 = vector.extract_strided_slice %34 {offsets = [2, 0, 0], sizes = [8, 16, 128], strides = [1, 1, 1]} : vector<10x24x128xf32> to vector<8x16x128xf32>
    %73 = vector.shape_cast %72 : vector<8x16x128xf32> to vector<128x128xf32>
    %c6 = arith.constant 6 : index
    %c0_31 = arith.constant 0 : index
    %c0_32 = arith.constant 0 : index
    %74 = vector.load %arg5[%c6, %c0_31, %c0_32] : memref<9x128x128xf32, #tpu.memory_space<vmem>>, vector<1x128x128xf32>
    %75 = vector.shape_cast %74 : vector<1x128x128xf32> to vector<128x128xf32>
    %cst_33 = arith.constant dense<0.000000e+00> : vector<128x128xf32>
    %76 = tpu.matmul %73, %75, %cst_33 {dimension_numbers = #tpu.dot_dimension_numbers<[1], [0], [0], [1], [0, 0, 1, 1], [], []>} : vector<128x128xf32>, vector<128x128xf32>, vector<128x128xf32> -> vector<128x128xf32>
    %77 = arith.addf %71, %76 : vector<128x128xf32>
    %78 = vector.extract_strided_slice %34 {offsets = [2, 1, 0], sizes = [8, 16, 128], strides = [1, 1, 1]} : vector<10x24x128xf32> to vector<8x16x128xf32>
    %79 = vector.shape_cast %78 : vector<8x16x128xf32> to vector<128x128xf32>
    %c7 = arith.constant 7 : index
    %c0_34 = arith.constant 0 : index
    %c0_35 = arith.constant 0 : index
    %80 = vector.load %arg5[%c7, %c0_34, %c0_35] : memref<9x128x128xf32, #tpu.memory_space<vmem>>, vector<1x128x128xf32>
    %81 = vector.shape_cast %80 : vector<1x128x128xf32> to vector<128x128xf32>
    %cst_36 = arith.constant dense<0.000000e+00> : vector<128x128xf32>
    %82 = tpu.matmul %79, %81, %cst_36 {dimension_numbers = #tpu.dot_dimension_numbers<[1], [0], [0], [1], [0, 0, 1, 1], [], []>} : vector<128x128xf32>, vector<128x128xf32>, vector<128x128xf32> -> vector<128x128xf32>
    %83 = arith.addf %77, %82 : vector<128x128xf32>
    %84 = vector.extract_strided_slice %34 {offsets = [2, 2, 0], sizes = [8, 16, 128], strides = [1, 1, 1]} : vector<10x24x128xf32> to vector<8x16x128xf32>
    %85 = vector.shape_cast %84 : vector<8x16x128xf32> to vector<128x128xf32>
    %c8 = arith.constant 8 : index
    %c0_37 = arith.constant 0 : index
    %c0_38 = arith.constant 0 : index
    %86 = vector.load %arg5[%c8, %c0_37, %c0_38] : memref<9x128x128xf32, #tpu.memory_space<vmem>>, vector<1x128x128xf32>
    %87 = vector.shape_cast %86 : vector<1x128x128xf32> to vector<128x128xf32>
    %cst_39 = arith.constant dense<0.000000e+00> : vector<128x128xf32>
    %88 = tpu.matmul %85, %87, %cst_39 {dimension_numbers = #tpu.dot_dimension_numbers<[1], [0], [0], [1], [0, 0, 1, 1], [], []>} : vector<128x128xf32>, vector<128x128xf32>, vector<128x128xf32> -> vector<128x128xf32>
    %89 = arith.addf %83, %88 : vector<128x128xf32>
    %c0_40 = arith.constant 0 : index
    %c0_41 = arith.constant 0 : index
    %90 = vector.load %arg6[%c0_40, %c0_41] : memref<1x128xf32, #tpu.memory_space<vmem>>, vector<1x128xf32>
    %91 = vector.broadcast %90 : vector<1x128xf32> to vector<128x128xf32>
    %92 = arith.addf %89, %91 : vector<128x128xf32>
    %93 = arith.negf %92 : vector<128x128xf32>
    %94 = math.exp %93 : vector<128x128xf32>
    %cst_42 = arith.constant 1.000000e+00 : f32
    %95 = vector.broadcast %cst_42 : f32 to vector<128x128xf32>
    %96 = arith.addf %95, %94 : vector<128x128xf32>
    %97 = arith.divf %95, %96 : vector<128x128xf32>
    %98 = arith.mulf %92, %97 : vector<128x128xf32>
    %99 = vector.extract_strided_slice %1 {offsets = [1, 1, 0], sizes = [8, 16, 128], strides = [1, 1, 1]} : vector<10x24x128xf32> to vector<8x16x128xf32>
    %100 = vector.shape_cast %99 : vector<8x16x128xf32> to vector<128x128xf32>
    %101 = arith.addf %98, %100 : vector<128x128xf32>
    %102 = vector.shape_cast %101 : vector<128x128xf32> to vector<8x16x128xf32>
    %c0_43 = arith.constant 0 : index
    %c0_44 = arith.constant 0 : index
    %c0_45 = arith.constant 0 : index
    %c0_46 = arith.constant 0 : index
    %103 = vector.load %arg7[%c0_43, %c0_44, %c0_45, %c0_46] : memref<1x8x16x128xf32, #tpu.memory_space<vmem>>, vector<1x8x16x128xf32>
    %104 = vector.shape_cast %103 : vector<1x8x16x128xf32> to vector<8x16x128xf32>
    %105 = vector.shape_cast %102 : vector<8x16x128xf32> to vector<1x8x16x128xf32>
    tpu.vector_store %arg7[%c0_43, %c0_44, %c0_45, %c0_46], %105 {strides = array<i32>} : memref<1x8x16x128xf32, #tpu.memory_space<vmem>>, vector<1x8x16x128xf32>,
    return
  }
  func.func @transform_0(%arg0: i32, %arg1: i32) -> (i32, i32, i32, i32) {
    %c2_i32 = arith.constant 2 : i32
    %0 = arith.muli %arg0, %c2_i32 : i32
    %1 = arith.addi %0, %arg1 : i32
    %c0_i32 = arith.constant 0 : i32
    %c0_i32_0 = arith.constant 0 : i32
    %c0_i32_1 = arith.constant 0 : i32
    %c0_i32_2 = arith.constant 0 : i32
    return %1, %c0_i32, %c0_i32_0, %c0_i32_1 : i32, i32, i32, i32
  }
  func.func @transform_1(%arg0: i32, %arg1: i32) -> (i32, i32) {
    %c0_i32 = arith.constant 0 : i32
    %c0_i32_0 = arith.constant 0 : i32
    %c0_i32_1 = arith.constant 0 : i32
    return %c0_i32, %c0_i32_0 : i32, i32
  }
  func.func @transform_2(%arg0: i32, %arg1: i32) -> (i32, i32) {
    %c0_i32 = arith.constant 0 : i32
    %c0_i32_0 = arith.constant 0 : i32
    %c0_i32_1 = arith.constant 0 : i32
    return %c0_i32, %c0_i32_0 : i32, i32
  }
  func.func @transform_3(%arg0: i32, %arg1: i32) -> (i32, i32, i32) {
    %c0_i32 = arith.constant 0 : i32
    %c0_i32_0 = arith.constant 0 : i32
    %c0_i32_1 = arith.constant 0 : i32
    %c0_i32_2 = arith.constant 0 : i32
    return %c0_i32, %c0_i32_0, %c0_i32_1 : i32, i32, i32
  }
  func.func @transform_4(%arg0: i32, %arg1: i32) -> (i32, i32) {
    %c0_i32 = arith.constant 0 : i32
    %c0_i32_0 = arith.constant 0 : i32
    %c0_i32_1 = arith.constant 0 : i32
    return %c0_i32, %c0_i32_0 : i32, i32
  }
  func.func @transform_5(%arg0: i32, %arg1: i32) -> (i32, i32, i32, i32) {
    %c0_i32 = arith.constant 0 : i32
    %c0_i32_0 = arith.constant 0 : i32
    %c0_i32_1 = arith.constant 0 : i32
    return %arg0, %arg1, %c0_i32, %c0_i32_0 : i32, i32, i32, i32
  }
}

</mosaic_0001>

<bundles_post_ra>
// kernel: bottleneck_forward.1
= control target key start
LH: loop header
LB: loop body
LE: loop exit
PB: predicated region body
PF: predicated region fallthrough
CT: control target
= control target key end

     0   :  { %s4935_s18 = smov 0   ;;  %s4937_s19 = smov 0   ;;  %s6914_s0 = inlined_call_operand.vmem [shape: f32[4,10,24,128], index: 0, kind: input, shape index: {}]   ;;  %s6915_s1 = inlined_call_operand.vmem [shape: f32[128,128], index: 1, kind: input, shape index: {}]   ;;  %s6916_s2 = inlined_call_operand.vmem [shape: f32[1,128], index: 2, kind: input, shape index: {}]   ;;  %s6917_s3 = inlined_call_operand.vmem [shape: f32[9,128,128], index: 3, kind: input, shape index: {}]   ;;  %s6918_s4 = inlined_call_operand.vmem [shape: f32[1,128], index: 4, kind: input, shape index: {}]   ;;  %s6919_s5 = inlined_call_operand.vmem [shape: f32[2,16,16,128], index: 5, kind: output, shape index: {}]  }
   0x1   :  { %s4939_s20 = smov 0   ;;  %s4941_s21 = smov 0  }
   0x2   :  { %s4943_s22 = smov 0  }
   0x3 LB: > { %s24_s23 = sadd.s32 1, %s4895_s20  ;;  %s27_s24 = sadd.s32 1, %s4899_s21  ;;  %s4903_s22 = sphi %s4943_s22, %s15_s22   ;;  %s4899_s21 = sphi %s4941_s21, %s7272_s21   ;;  %s4895_s20 = sphi %s4939_s20, %s7271_s20   ;;  %s4891_s19 = sphi %s4937_s19, %s7270_s19   ;;  %s4887_s18 = sphi %s4935_s18, %s7269_s18  }
   0x4   : > { %p25_p0 = scmp.ge.s32.totalorder %s24_s23, 2  ;;  %p3027_p1 = scmp.ge.s32.totalorder %s4903_s22, 1 }
   0x5   : > { %p209_p2 = scmp.lt.s32.totalorder %s4903_s22, 5 }
   0x6   : > { %s7274_s23 = smov (%p25_p0, %s24_s23), 0  ;;  %s7276_s24 = smov (!%p25_p0, %s27_s24), %s4899_s21 }
   0x7   : > { %p210_p3 = pnand %p3027_p1, %p209_p2  ;;  %p29_p4 = scmp.ge.s32.totalorder %s7276_s24, 2 }
   0x9   : > { %s7278_s24 = smov (%p29_p4, %s7276_s24), 0  ;;  %213 = sbr.rel (%p210_p3) target bundleno = 759 (0x2f7), region = 40 }
  0x10   : > { %v294_v0 = vld [vmem:[%s6915_s1] sm:$0xff]  ;;  %v295_v1 = vld [vmem:[%s6915_s1 + $0x8] sm:$0xff]  ;;  %v296_v2 = vld [vmem:[%s6915_s1 + $0x10] sm:$0xff]  ;;  %s3028_s6 = sshll.u32 %s4891_s19, 1  ;;  %vm6938_vm0 = vcmask 1046528   ;;  %s5285_s27 = sshll.u32 %s4887_s18, 3 }
  0x11   : > { %v4176_v3 = vpack.c.bf16 %v295_v1, %v294_v0  ;;  %v297_v4 = vld [vmem:[%s6915_s1 + $0x18] sm:$0xff]  ;;  %s245_s9 = sadd.s32 %s4887_s18, %s3028_s6  ;;  %v298_v6 = vld [vmem:[%s6915_s1 + $0x20] sm:$0xff]  ;;  %v299_v7 = vld [vmem:[%s6915_s1 + $0x28] sm:$0xff]  ;;  %p254_p6 = scmp.lt.s32.totalorder %s4891_s19, 1 }
  0x12   : > { %v4180_v5 = vpack.c.bf16 %v297_v4, %v296_v2  ;;  %p246_p5 = scmp.lt.s32.totalorder %s245_s9, 3  ;;  %v4184_v8 = vpack.c.bf16 %v299_v7, %v298_v6  ;;  %v300_v9 = vld [vmem:[%s6915_s1 + $0x30] sm:$0xff]  ;;  %v301_v10 = vld [vmem:[%s6915_s1 + $0x38] sm:$0xff]  ;;  %v302_v11 = vld [vmem:[%s6915_s1 + $0x40] sm:$0xff]  ;;  %p256_p7 = scmp.lt.s32.totalorder %s5285_s27, 15 }
  0x13   : > { %4177 = vmatprep.subr.bf16.mxu0 %v4176_v3  ;;  %v303_v12 = vld [vmem:[%s6915_s1 + $0x48] sm:$0xff]  ;;  %v4188_v13 = vpack.c.bf16 %v301_v10, %v300_v9  ;;  %v304_v14 = vld [vmem:[%s6915_s1 + $0x50] sm:$0xff]  ;;  %v305_v15 = vld [vmem:[%s6915_s1 + $0x58] sm:$0xff]  ;;  %s7282_s19 = smov (!%p254_p6, %s4891_s19), 1 }
  0x14   : > { %4179 = vmatpush3.bf16.msra.mxu0 %v4176_v3  ;;  %s7280_s9 = smov (!%p246_p5, %s245_s9), 3  ;;  %v4192_v20 = vpack.c.bf16 %v303_v12, %v302_v11  ;;  %v5034_v27 = vpack.c.bf16 %v305_v15, %v304_v14  ;;  %v306_v59 = vld [vmem:[%s6915_s1 + $0x60] sm:$0xff]  ;;  %v307_v2 = vld [vmem:[%s6915_s1 + $0x68] sm:$0xff]  ;;  %s3032_s8 = sshll.u32 %s7282_s19, 5 }
  0x15   : > { %4181 = vmatprep.subr.bf16.mxu0 %v4180_v5  ;;  %s4640_s25 = smul.u32 240, %s7280_s9 }
  0x17   : > { %s5004_s7 = scalar_lea.vmem %s6914_s0, %s4640_s25 }
  0x18   : > { %4183 = vmatpush3.bf16.msra.mxu0 %v4180_v5  ;;  %v264_v16 = vld [vmem:[%s5004_s7] sm:$0xff]  ;;  %v5014_v17 = vld [vmem:[%s5004_s7 + $0x18] sm:$0xff]  ;;  %v5020_v19 = vld [vmem:[%s5004_s7 + $0x28] sm:$0xff] }
  0x19   : > { %4185 = vmatprep.subr.bf16.mxu0 %v4184_v8  ;;  %3627 = vmatprep.mubr.f32.mxu0 %v264_v16  ;;  %v5017_v18 = vld [vmem:[%s5004_s7 + $0x20] sm:$0xff]  ;;  %v2843_v21 = vrot.slane %v5014_v17, 1  ;;  %v2846_v23 = vrot.slane %v5020_v19, 1  ;;  %v5026_v24 = vld [vmem:[%s5004_s7 + $0x30] sm:$0xff]  ;;  %v5029_v25 = vld [vmem:[%s5004_s7 + $0x38] sm:$0xff] }
  0x1a   : > { %v2844_v22 = vrot.slane %v5017_v18, 1  ;;  %v5032_v26 = vld [vmem:[%s5004_s7 + $0x40] sm:$0xff]  ;;  %v2848_v28 = vrot.slane %v5026_v24, 1  ;;  %v2849_v29 = vrot.slane %v5029_v25, 1  ;;  %v5040_v31 = vld [vmem:[%s5004_s7 + $0x48] sm:$0xff]  ;;  %v5043_v32 = vld [vmem:[%s5004_s7 + $0x50] sm:$0xff] }
  0x1b   : > { %v2851_v30 = vrot.slane %v5032_v26, 1  ;;  %v2853_v35 = vrot.slane %v5040_v31, 1  ;;  %v2854_v36 = vrot.slane %v5043_v32, 1  ;;  %v5054_v37 = vld [vmem:[%s5004_s7 + $0x58] sm:$0xff]  ;;  %v5057_v38 = vld [vmem:[%s5004_s7 + $0x60] sm:$0xff]  ;;  %v5068_v43 = vld [vmem:[%s5004_s7 + $0x68] sm:$0xff] }
  0x1c   : > { %4187 = vmatpush3.bf16.msra.mxu0 %v4184_v8  ;;  %v5046_v33 = vsel %vm6938_vm0, %v2843_v21, %v2844_v22  ;;  %v5049_v34 = vsel %vm6938_vm0, %v2844_v22, %v2846_v23  ;;  %v5060_v39 = vsel %vm6938_vm0, %v2848_v28, %v2849_v29  ;;  %v2856_v41 = vrot.slane %v5054_v37, 1  ;;  %v5071_v44 = vld [vmem:[%s5004_s7 + $0x70] sm:$0xff]  ;;  %v5074_v45 = vld [vmem:[%s5004_s7 + $0x78] sm:$0xff]  ;;  %v5083_v50 = vld [vmem:[%s5004_s7 + $0x80] sm:$0xff] }
  0x1d   : > { %4189 = vmatprep.subr.bf16.mxu0 %v4188_v13  ;;  %7005 = vst [vmem:[#allocation2_spill] sm:$0xff] %v5046_v33  ;;  %7006 = vst [vmem:[#allocation3_spill] sm:$0xff] %v5049_v34  ;;  %v5063_v40 = vsel %vm6938_vm0, %v2849_v29, %v2851_v30  ;;  %v2858_v42 = vrot.slane %v5057_v38, 1  ;;  %v5077_v46 = vsel %vm6938_vm0, %v2853_v35, %v2854_v36  ;;  %v2859_v47 = vrot.slane %v5068_v43, 1  ;;  %v5086_v51 = vld [vmem:[%s5004_s7 + $0x88] sm:$0xff]  ;;  %v5089_v52 = vld [vmem:[%s5004_s7 + $0x90] sm:$0xff] }
  0x1e   : > { %7007 = vst [vmem:[#allocation4_spill] sm:$0xff] %v5060_v39  ;;  %7008 = vst [vmem:[#allocation5_spill] sm:$0xff] %v5063_v40  ;;  %v2861_v48 = vrot.slane %v5071_v44, 1  ;;  %v2863_v49 = vrot.slane %v5074_v45, 1  ;;  %v5092_v53 = vsel %vm6938_vm0, %v2854_v36, %v2856_v41  ;;  %v2864_v54 = vrot.slane %v5083_v50, 1  ;;  %v283_v57 = vld [vmem:[%s5004_s7 + $0x98] sm:$0xff] }
  0x1f   : > { %7009 = vst [vmem:[#allocation6_spill] sm:$0xff] %v5077_v46  ;;  %7010 = vst [vmem:[#allocation7_spill] sm:$0xff] %v5092_v53  ;;  %v2866_v55 = vrot.slane %v5086_v51, 1  ;;  %v2868_v56 = vrot.slane %v5089_v52, 1  ;;  %v284_v58 = vld [vmem:[%s5004_s7 + $0xa0] sm:$0xff]  ;;  %v5103_v60 = vsel %vm6938_vm0, %v2858_v42, %v2859_v47  ;;  %v2869_v62 = vrot.slane %v283_v57, 1 }
  0x20   : > { %4191 = vmatpush3.bf16.msra.mxu0 %v4188_v13  ;;  %7011 = vst [vmem:[#allocation8_spill] sm:$0xff] %v5103_v60  ;;  %v5106_v61 = vsel %vm6938_vm0, %v2859_v47, %v2861_v48  ;;  %v2871_v63 = vrot.slane %v284_v58, 1  ;;  %v285_v0 = vld [vmem:[%s5004_s7 + $0xa8] sm:$0xff]  ;;  %v286_v1 = vld [vmem:[%s5004_s7 + $0xb0] sm:$0xff]  ;;  %v5114_v3 = vsel %vm6938_vm0, %v2863_v49, %v2864_v54  ;;  %v287_v7 = vld [vmem:[%s5004_s7 + $0xb8] sm:$0xff]  ;;  %v4200_v22 = vpack.c.bf16 %v307_v2, %v306_v59 }
  0x21   : > { %4193 = vmatprep.subr.bf16.mxu0 %v4192_v20  ;;  %7012 = vst [vmem:[#allocation9_spill] sm:$0xff] %v5106_v61  ;;  %7013 = vst [vmem:[#allocation10_spill] sm:$0xff] %v5114_v3  ;;  %v5117_v4 = vsel %vm6938_vm0, %v2864_v54, %v2866_v55  ;;  %v2873_v5 = vrot.slane %v285_v0, 1  ;;  %v2874_v6 = vrot.slane %v286_v1, 1  ;;  %v288_v8 = vld [vmem:[%s5004_s7 + $0xc0] sm:$0xff]  ;;  %v5122_v9 = vsel %vm6938_vm0, %v2868_v56, %v2869_v62  ;;  %v289_v13 = vld [vmem:[%s5004_s7 + $0xc8] sm:$0xff] }
  0x22   : > { %7014 = vst [vmem:[#allocation11_spill] sm:$0xff] %v5117_v4  ;;  %7015 = vst [vmem:[#allocation12_spill] sm:$0xff] %v5122_v9  ;;  %v5125_v10 = vsel %vm6938_vm0, %v2869_v62, %v2871_v63  ;;  %v2876_v11 = vrot.slane %v287_v7, 1  ;;  %v2878_v12 = vrot.slane %v288_v8, 1  ;;  %v290_v14 = vld [vmem:[%s5004_s7 + $0xd0] sm:$0xff]  ;;  %v2879_v16 = vrot.slane %v289_v13, 1 }
  0x23   : > { %7016 = vst [vmem:[#allocation13_spill] sm:$0xff] %v5125_v10  ;;  %v5130_v15 = vsel %vm6938_vm0, %v2873_v5, %v2874_v6  ;;  %v2881_v21 = vrot.slane %v290_v14, 1  ;;  %v308_v28 = vld [vmem:[%s6915_s1 + $0x70] sm:$0xff]  ;;  %v265_v36 = vld [vmem:[%s5004_s7 + $0x8] sm:$0xff]  ;;  %v3070_v47 = vld [vmem:[%s6917_s3 + $0xa0] sm:$0xff] }
  0x24   : > { %4195 = vmatpush3.bf16.msra.mxu0 %v4192_v20  ;;  %7017 = vst [vmem:[#allocation14_spill] sm:$0xff] %v5130_v15  ;;  %v5134_v23 = vsel %vm6938_vm0, %v2874_v6, %v2876_v11  ;;  %v309_v20 = vld [vmem:[%s6915_s1 + $0x78] sm:$0xff]  ;;  %v5143_v29 = vsel %vm6938_vm0, %v2878_v12, %v2879_v16  ;;  %v266_v41 = vld [vmem:[%s5004_s7 + $0x10] sm:$0xff]  ;;  %v3071_v48 = vld [vmem:[%s6917_s3 + $0xa8] sm:$0xff] }
  0x25   : > { %4197 = vmatprep.subr.bf16.mxu0 %v5034_v27  ;;  %7018 = vst [vmem:[#allocation15_spill] sm:$0xff] %v5134_v23  ;;  %7019 = vst [vmem:[#allocation16_spill] sm:$0xff] %v5143_v29  ;;  %v5146_v30 = vsel %vm6938_vm0, %v2879_v16, %v2881_v21  ;;  %v4204_v35 = vpack.c.bf16 %v309_v20, %v308_v28  ;;  %v3116_v42 = vld [vmem:[%s6917_s3 + $0x190] sm:$0xff]  ;;  %v3118_v49 = vld [vmem:[%s6917_s3 + $0x1a0] sm:$0xff] }
  0x26   : > { %7020 = vst [vmem:[#allocation17_spill] sm:$0xff] %v5146_v30  ;;  %v3072_v54 = vld [vmem:[%s6917_s3 + $0xb0] sm:$0xff]  ;;  %v3073_v55 = vld [vmem:[%s6917_s3 + $0xb8] sm:$0xff]  ;;  %v3074_v62 = vld [vmem:[%s6917_s3 + $0xc0] sm:$0xff] }
  0x27   : > { %v3120_v56 = vld [vmem:[%s6917_s3 + $0x1b0] sm:$0xff]  ;;  %v3075_v63 = vld [vmem:[%s6917_s3 + $0xc8] sm:$0xff]  ;;  %v3125_v12 = vld [vmem:[%s6917_s3 + $0x1d8] sm:$0xff] }
  0x28   : > { %4199 = vmatpush3.bf16.msra.mxu0 %v5034_v27  ;;  %v3123_v2 = vld [vmem:[%s6917_s3 + $0x1c8] sm:$0xff]  ;;  %v3076_v6 = vld [vmem:[%s6917_s3 + $0xd0] sm:$0xff]  ;;  %v3157_v29 = vld [vmem:[%s6917_s3 + $0x258] sm:$0xff] }
  0x29   : > { %4201 = vmatprep.subr.bf16.mxu0 %v4200_v22  ;;  %v3079_v16 = vld [vmem:[%s6917_s3 + $0xe8] sm:$0xff]  ;;  %v3161_v4 = vld [vmem:[%s6917_s3 + $0x278] sm:$0xff]  ;;  %v957_v60 = vld [vmem:[%s6917_s3 + $0x70] sm:$0xff] }
  0x2a   : > { %v3127_v28 = vld [vmem:[%s6917_s3 + $0x1e8] sm:$0xff]  ;;  %v3098_v53 = vld [vmem:[%s6917_s3 + $0x100] sm:$0xff] }
  0x2b   : > { %v3159_v23 = vld [vmem:[%s6917_s3 + $0x268] sm:$0xff] }
  0x2c   : > { %4203 = vmatpush3.bf16.msra.mxu0 %v4200_v22  ;;  %v3126_v22 = vld [vmem:[%s6917_s3 + $0x1e0] sm:$0xff] }
  0x2d   : > { %4205 = vmatprep.subr.bf16.mxu0 %v4204_v35  ;;  %v4328_v20 = vpack.c.bf16 %v3127_v28, %v3126_v22 }
  0x30   : > { %4207 = vmatpush3.bf16.msra.mxu0 %v4204_v35  ;;  %v3080_v35 = vld [vmem:[%s6917_s3 + $0xf0] sm:$0xff] }
  0x33   : > { %3628 = vmatmul.mubr.f32.vlgmr.msra.gmra.mrb[0].mxu0 %v265_v36  ;;  %v3081_v36 = vld [vmem:[%s6917_s3 + $0xf8] sm:$0xff] }
  0x34   : > { %3630 = vmatprep.mubr.f32.mxu0 %v266_v41  ;;  %v4236_v41 = vpack.c.bf16 %v3081_v36, %v3080_v35 }
  0x37   : > { %3631 = vmatmul.mubr.f32.gmra.mrb[2].mxu0 %v5014_v17  ;;  %v291_v17 = vld [vmem:[%s5004_s7 + $0xd8] sm:$0xff] }
  0x38   : > { %3633 = vmatprep.mubr.f32.mxu0 %v5017_v18  ;;  %v292_v18 = vld [vmem:[%s5004_s7 + $0xe0] sm:$0xff] }
  0x3b   : > { %3634 = vmatmul.mubr.f32.gmra.mrb[4].mxu0 %v5020_v19  ;;  %v293_v19 = vld [vmem:[%s5004_s7 + $0xe8] sm:$0xff] }
  0x3c   : > { %3636 = vmatprep.mubr.f32.mxu0 %v5026_v24  ;;  %v3066_v24 = vld [vmem:[%s6917_s3 + $0x80] sm:$0xff] }
  0x3f   : > { %3637 = vmatmul.mubr.f32.gmra.mrb[6].mxu0 %v5029_v25  ;;  %v3067_v25 = vld [vmem:[%s6917_s3 + $0x88] sm:$0xff] }
  0x40   : > { %3639 = vmatprep.mubr.f32.mxu0 %v5032_v26  ;;  %v3114_v26 = vld [vmem:[%s6917_s3 + $0x180] sm:$0xff]  ;;  %v4208_v27 = vpack.c.bf16 %v3067_v25, %v3066_v24  ;;  %v3147_v25 = vld [vmem:[%s6917_s3 + $0x208] sm:$0xff] }
  0x41   : > { %v3146_v24 = vld [vmem:[%s6917_s3 + $0x200] sm:$0xff] }
  0x42   : > { %4209 = vmatprep.subr.bf16.mxu0 %v4208_v27 }
  0x43   : > { %3640 = vmatmul.mubr.f32.gmra.mrb[8].mxu0 %v5040_v31  ;;  %v3115_v31 = vld [vmem:[%s6917_s3 + $0x188] sm:$0xff] }
  0x44   : > { %3642 = vmatprep.mubr.f32.mxu0 %v5043_v32  ;;  %v4304_v32 = vpack.c.bf16 %v3115_v31, %v3114_v26  ;;  %4211 = vmatpush3.bf16.msra.mxu0 %v4208_v27  ;;  %v5272_v26 = vpack.c.bf16 %v3147_v25, %v3146_v24  ;;  %v943_v27 = vld [vmem:[%s6917_s3] sm:$0xff]  ;;  %v944_v31 = vld [vmem:[%s6917_s3 + $0x8] sm:$0xff] }
  0x46   : > { %4305 = vmatprep.subr.bf16.mxu1 %v4304_v32 }
  0x47   : > { %3643 = vmatmul.mubr.f32.gmra.mrb[10].mxu0 %v5054_v37  ;;  %v3068_v37 = vld [vmem:[%s6917_s3 + $0x90] sm:$0xff]  ;;  %4307 = vmatpush3.bf16.msra.mxu1 %v4304_v32  ;;  %v5280_v32 = vpack.c.bf16 %v944_v31, %v943_v27 }
  0x48   : > { %3645 = vmatprep.mubr.f32.mxu0 %v5057_v38  ;;  %v3069_v38 = vld [vmem:[%s6917_s3 + $0x98] sm:$0xff]  ;;  %v945_v31 = vld [vmem:[%s6917_s3 + $0x10] sm:$0xff] }
  0x4b   : > { %3646 = vmatmul.mubr.f32.gmra.mrb[12].mxu0 %v5068_v43  ;;  %v4212_v43 = vpack.c.bf16 %v3069_v38, %v3068_v37  ;;  %v753_v37 = vlaneseq }
  0x4c   : > { %3648 = vmatprep.mubr.f32.mxu0 %v5071_v44  ;;  %v3117_v44 = vld [vmem:[%s6917_s3 + $0x198] sm:$0xff] }
  0x4d   : > { %4213 = vmatprep.subr.bf16.mxu0 %v4212_v43  ;;  %v5287_v38 = vshrl.u32 %v753_v37, 7  ;;  %v946_v37 = vld [vmem:[%s6917_s3 + $0x18] sm:$0xff] }
  0x4e   : > { %4215 = vmatpush3.bf16.msra.mxu0 %v4212_v43 }
  0x4f   : > { %3649 = vmatmul.mubr.f32.gmra.mrb[14].mxu0 %v5074_v45  ;;  %v4308_v45 = vpack.c.bf16 %v3117_v44, %v3116_v42  ;;  %v5290_v42 = vstv %s5285_s27  ;;  %v5293_v43 = vadd.s32 16, %v5287_v38  ;;  %vm6931_vm10 = vcmp.ge.s32.totalorder %v5287_v38, 1  ;;  %s7284_s27 = smov (!%p256_p7, %s5285_s27), 15 }
  0x50   : > { %3651 = vmatprep.mubr.f32.mxu0 %v5083_v50  ;;  %v4216_v50 = vpack.c.bf16 %v3071_v48, %v3070_v47  ;;  %v752_v44 = vadd.s32 9, %v5290_v42  ;;  %v7024_v47 = vmov 0  ;;  %v5312_v48 = vld [vmem:[%s6916_s2] ss:$0 sm:$0xff]  ;;  %vm757_vm6 = vcmp.ge.s32.totalorder %v5290_v42, 1  ;;  %s3031_s6 = sshll.u32 %s7284_s27, 1 }
  0x51   : > { %4309 = vmatprep.subr.bf16.mxu1 %v4308_v45  ;;  %vm6937_vm3 = vcmp.le.s32.totalorder %v5293_v43, 16  ;;  %vm767_vm7 = vcmp.le.s32.totalorder %v5290_v42, 16  ;;  %v5366_v25 = vadd.s32 2, %v5290_v42  ;;  %v5369_v27 = vadd.s32 3, %v5290_v42  ;;  %s260_s9 = sadd.s32 %s3032_s8, %s3031_s6 }
  0x52   : > { %4311 = vmatpush3.bf16.msra.mxu1 %v4308_v45  ;;  %4217 = vmatprep.subr.bf16.mxu0 %v4216_v50  ;;  %vm766_vm1 = vcmp.ge.s32.totalorder %v752_v44, 1  ;;  %vm776_vm2 = vcmp.le.s32.totalorder %v752_v44, 16  ;;  %v7021_v45 = vmov 0  ;;  %vm5467_vm11 = vmand %vm757_vm6, %vm767_vm7  ;;  %s3033_s10 = sshll.u32 %s260_s9, 3 }
  0x53   : > { %3652 = vmatmul.mubr.f32.gmra.mrb[16].mxu0 %v5086_v51  ;;  %v3119_v51 = vld [vmem:[%s6917_s3 + $0x1a8] sm:$0xff]  ;;  %vm5297_vm4 = vmand %vm766_vm1, %vm776_vm2  ;;  %vm759_vm13 = vcmp.ge.s32.totalorder %v5366_v25, 1  ;;  %vm769_vm14 = vcmp.le.s32.totalorder %v5366_v25, 16  ;;  %vm760_vm1 = vcmp.ge.s32.totalorder %v5369_v27, 1  ;;  %vm770_vm2 = vcmp.le.s32.totalorder %v5369_v27, 16  ;;  %s6819_s7 = scalar_lea.vmem %s6919_s5, %s3033_s10 }
  0x54   : > { %3654 = vmatprep.mubr.f32.mxu0 %v5089_v52  ;;  %v4312_v52 = vpack.c.bf16 %v3119_v51, %v3118_v49  ;;  %4219 = vmatpush3.bf16.msra.mxu0 %v4216_v50  ;;  %v7022_v45 = vsel %vm5297_vm4, 4294967295, %v7021_v45  ;;  %vm5305_vm5 = vmand %vm5297_vm4, %vm6937_vm3 }
  0x55   : > { %7023 = vst [vmem:[#allocation18_spill] sm:$0xff] %v7022_v45  ;;  %v7025_v47 = vsel %vm5305_vm5, 4294967295, %v7024_v47  ;;  %vm5542_vm15 = vmand %vm5467_vm11, %vm6931_vm10 }
  0x56   : > { %4313 = vmatprep.subr.bf16.mxu1 %v4312_v52  ;;  %7026 = vst [vmem:[#allocation19_spill] sm:$0xff] %v7025_v47  ;;  %vm5591_vm7 = vmand %vm5467_vm11, %vm6937_vm3 }
  0x57   : > { %3655 = vmatmul.mubr.f32.gmra.mrb[18].mxu0 %v283_v57  ;;  %4315 = vmatpush3.bf16.msra.mxu1 %v4312_v52  ;;  %v4220_v57 = vpack.c.bf16 %v3073_v55, %v3072_v54 }
  0x58   : > { %3657 = vmatprep.mubr.f32.mxu0 %v284_v58  ;;  %v3121_v58 = vld [vmem:[%s6917_s3 + $0x1b8] sm:$0xff] }
  0x59   : > { %v4316_v59 = vpack.c.bf16 %v3121_v58, %v3120_v56  ;;  %4221 = vmatprep.subr.bf16.mxu0 %v4220_v57 }
  0x5a   : > { %4223 = vmatpush3.bf16.msra.mxu0 %v4220_v57 }
  0x5b   : > { %3658 = vmatmul.mubr.f32.gmra.mrb[20].mxu0 %v285_v0  ;;  %4317 = vmatprep.subr.bf16.mxu1 %v4316_v59  ;;  %v3122_v0 = vld [vmem:[%s6917_s3 + $0x1c0] sm:$0xff] }
  0x5c   : > { %3660 = vmatprep.mubr.f32.mxu0 %v286_v1  ;;  %4319 = vmatpush3.bf16.msra.mxu1 %v4316_v59  ;;  %v4224_v1 = vpack.c.bf16 %v3075_v63, %v3074_v62  ;;  %v4320_v5 = vpack.c.bf16 %v3123_v2, %v3122_v0 }
  0x5e   : > { %4225 = vmatprep.subr.bf16.mxu0 %v4224_v1  ;;  %4321 = vmatprep.subr.bf16.mxu1 %v4320_v5 }
  0x5f   : > { %3661 = vmatmul.mubr.f32.gmra.mrb[22].mxu0 %v287_v7  ;;  %v3077_v7 = vld [vmem:[%s6917_s3 + $0xd8] sm:$0xff] }
  0x60   : > { %3663 = vmatprep.mubr.f32.mxu0 %v288_v8  ;;  %4227 = vmatpush3.bf16.msra.mxu0 %v4224_v1  ;;  %v3124_v8 = vld [vmem:[%s6917_s3 + $0x1d0] sm:$0xff]  ;;  %v4228_v11 = vpack.c.bf16 %v3077_v7, %v3076_v6 }
  0x61   : > { %4323 = vmatpush3.bf16.msra.mxu1 %v4320_v5 }
  0x62   : > { %4229 = vmatprep.subr.bf16.mxu0 %v4228_v11 }
  0x63   : > { %3664 = vmatmul.mubr.f32.gmra.mrb[24].mxu0 %v289_v13  ;;  %v4324_v13 = vpack.c.bf16 %v3125_v12, %v3124_v8 }
  0x64   : > { %3666 = vmatprep.mubr.f32.mxu0 %v290_v14  ;;  %4231 = vmatpush3.bf16.msra.mxu0 %v4228_v11  ;;  %v3078_v14 = vld [vmem:[%s6917_s3 + $0xe0] sm:$0xff]  ;;  %v5339_v11 = vadd.s32 1, %v5290_v42 }
  0x65   : > { %4325 = vmatprep.subr.bf16.mxu1 %v4324_v13  ;;  %v4232_v21 = vpack.c.bf16 %v3079_v16, %v3078_v14 }
  0x66   : > { %4327 = vmatpush3.bf16.msra.mxu1 %v4324_v13  ;;  %vm758_vm8 = vcmp.ge.s32.totalorder %v5339_v11, 1  ;;  %vm768_vm9 = vcmp.le.s32.totalorder %v5339_v11, 16 }
  0x67   : > { %3667 = vmatmul.mubr.f32.gmra.mrb[26].mxu0 %v291_v17  ;;  %4233 = vmatprep.subr.bf16.mxu0 %v4232_v21  ;;  %v3128_v17 = vld [vmem:[%s6917_s3 + $0x1f0] sm:$0xff]  ;;  %vm5503_vm12 = vmand %vm758_vm8, %vm768_vm9 }
  0x68   : > { %3669 = vmatprep.mubr.f32.mxu0 %v292_v18  ;;  %4329 = vmatprep.subr.bf16.mxu1 %v4328_v20  ;;  %v3129_v18 = vld [vmem:[%s6917_s3 + $0x1f8] sm:$0xff]  ;;  %vm5571_vm6 = vmand %vm5503_vm12, %vm6931_vm10 }
  0x69   : > { %4235 = vmatpush3.bf16.msra.mxu0 %v4232_v21  ;;  %vm5617_vm8 = vmand %vm5503_vm12, %vm6937_vm3 }
  0x6a   : > { %4331 = vmatpush3.bf16.msra.mxu1 %v4328_v20  ;;  %4237 = vmatprep.subr.bf16.mxu0 %v4236_v41  ;;  %vm5649_vm9 = vmand %vm759_vm13, %vm769_vm14 }
  0x6b   : > { %3670 = vmatmul.mubr.f32.gmra.mrb[28].mxu0 %v293_v19  ;;  %v4332_v19 = vpack.c.bf16 %v3129_v18, %v3128_v17  ;;  %v3148_v18 = vld [vmem:[%s6917_s3 + $0x210] sm:$0xff]  ;;  %vm5671_vm13 = vmand %vm760_vm1, %vm770_vm2 }
  0x6c   : > { %vm5691_vm14 = vmand %vm5649_vm9, %vm6931_vm10 }
  0x6d   : > { %4333 = vmatprep.subr.bf16.mxu1 %v4332_v19  ;;  %4239 = vmatpush3.bf16.msra.mxu0 %v4236_v41  ;;  %vm5713_vm1 = vmand %vm5671_vm13, %vm6931_vm10 }
  0x6e   : > { %4335 = vmatpush3.bf16.msra.mxu1 %v4332_v19  ;;  %4241 = vmatprep.subr.bf16.mxu0 %v5280_v32  ;;  %v3149_v19 = vld [vmem:[%s6917_s3 + $0x218] sm:$0xff]  ;;  %vm5732_vm2 = vmand %vm5649_vm9, %vm6937_vm3 }
  0x6f   : > { %4337 = vmatprep.subr.bf16.mxu1 %v5272_v26  ;;  %vm5746_vm10 = vmand %vm5671_vm13, %vm6937_vm3 }
 0x106   : > { %v3629_v49 = vpop.f32.mrb[0].mxu0 }
 0x107   : > { %v5315_v50 = vadd.f32 %v3629_v49, %v5312_v48  ;;  %v383_v51 = vpop.f32.mrb[1].mxu0 }
 0x108   : > { %v5318_v52 = vadd.f32 %v5312_v48, %v383_v51  ;;  %v5380_v51 = vadd.s32 4, %v5290_v42 }
 0x109   : > { %v3036_v54 = vmul.f32 -1.442695, %v5315_v50 }
 0x10a   : > { %v3035_v55 = vmul.f32 -1.442695, %v5318_v52  ;;  %v3632_v56 = vpop.f32.mrb[2].mxu0 }
 0x10b   : > { %4681 = vpow2.f32 %v3036_v54  ;;  %v5323_v57 = vadd.f32 %v3632_v56, %v5312_v48  ;;  %v393_v58 = vpop.f32.mrb[3].mxu0  ;;  %v5383_v54 = vadd.s32 5, %v5290_v42  ;;  %v3151_v56 = vld [vmem:[%s6917_s3 + $0x228] sm:$0xff] }
 0x10c   : > { %4683 = vpow2.f32 %v3035_v55  ;;  %v5326_v59 = vadd.f32 %v5312_v48, %v393_v58  ;;  %v3150_v55 = vld [vmem:[%s6917_s3 + $0x220] sm:$0xff] }
 0x10d   : > { %v3038_v62 = vmul.f32 -1.442695, %v5323_v57  ;;  %vm7077_vm3 = vcmp.ge.s32.totalorder %v5383_v54, 1 }
 0x10e   : > { %v3037_v63 = vmul.f32 -1.442695, %v5326_v59  ;;  %v3635_v0 = vpop.f32.mrb[4].mxu0 }
 0x10f   : > { %4685 = vpow2.f32 %v3038_v62  ;;  %v5331_v1 = vadd.f32 %v3635_v0, %v5312_v48  ;;  %v403_v2 = vpop.f32.mrb[5].mxu0 }
 0x110   : > { %4687 = vpow2.f32 %v3037_v63  ;;  %v5334_v5 = vadd.f32 %v5312_v48, %v403_v2  ;;  %v5392_v2 = vpack.c.bf16 %v3149_v19, %v3148_v18  ;;  %v950_v18 = vld [vmem:[%s6917_s3 + $0x38] sm:$0xff]  ;;  %v3154_v19 = vld [vmem:[%s6917_s3 + $0x240] sm:$0xff] }
 0x111   : > { %v3040_v6 = vmul.f32 -1.442695, %v5331_v1 }
 0x112   : > { %v3039_v7 = vmul.f32 -1.442695, %v5334_v5  ;;  %v3638_v8 = vpop.f32.mrb[6].mxu0 }
 0x113   : > { %4689 = vpow2.f32 %v3040_v6  ;;  %v5342_v12 = vadd.f32 %v3638_v8, %v5312_v48  ;;  %v413_v13 = vpop.f32.mrb[7].mxu0  ;;  %v947_v6 = vld [vmem:[%s6917_s3 + $0x20] sm:$0xff] }
 0x114   : > { %4691 = vpow2.f32 %v3039_v7  ;;  %v5345_v14 = vadd.f32 %v5312_v48, %v413_v13  ;;  %v948_v7 = vld [vmem:[%s6917_s3 + $0x28] sm:$0xff] }
 0x115   : > { %v4682_v16 = vpop.eup %4681  ;;  %v3042_v21 = vmul.f32 -1.442695, %v5342_v12 }
 0x116   : > { %v4684_v22 = vpop.eup %4683  ;;  %v623_v28 = vadd.f32 1.0, %v4682_v16  ;;  %v3041_v20 = vmul.f32 -1.442695, %v5345_v14  ;;  %v3641_v35 = vpop.f32.mrb[8].mxu0 }
 0x117   : > { %v622_v36 = vadd.f32 1.0, %v4684_v22  ;;  %4693 = vpow2.f32 %v3042_v21  ;;  %v5354_v41 = vadd.f32 %v3641_v35, %v5312_v48  ;;  %v423_v17 = vpop.f32.mrb[9].mxu0  ;;  %v5403_v21 = vpack.c.bf16 %v946_v37, %v945_v31  ;;  %v3152_v22 = vld [vmem:[%s6917_s3 + $0x230] sm:$0xff] }
 0x118   : > { %4695 = vrcp.f32 %v623_v28  ;;  %v5363_v24 = vadd.f32 %v5312_v48, %v423_v17  ;;  %v3153_v28 = vld [vmem:[%s6917_s3 + $0x238] sm:$0xff]  ;;  %v5415_v35 = vadd.s32 6, %v5290_v42  ;;  %v949_v17 = vld [vmem:[%s6917_s3 + $0x30] sm:$0xff] }
 0x119   : > { %v4686_v44 = vpop.eup %4685  ;;  %4697 = vrcp.f32 %v622_v36  ;;  %v3044_v49 = vmul.f32 -1.442695, %v5354_v41  ;;  %v5417_v36 = vpack.c.bf16 %v3151_v56, %v3150_v55  ;;  %v3155_v55 = vld [vmem:[%s6917_s3 + $0x248] sm:$0xff]  ;;  %v951_v56 = vld [vmem:[%s6917_s3 + $0x40] sm:$0xff] }
 0x11a   : > { %v4688_v58 = vpop.eup %4687  ;;  %v625_v62 = vadd.f32 1.0, %v4686_v44  ;;  %4699 = vpow2.f32 %v3041_v20  ;;  %v3043_v63 = vmul.f32 -1.442695, %v5363_v24  ;;  %v3644_v0 = vpop.f32.mrb[10].mxu0  ;;  %v5430_v44 = vadd.s32 7, %v5290_v42 }
 0x11b   : > { %v624_v8 = vadd.f32 1.0, %v4688_v58  ;;  %4701 = vpow2.f32 %v3044_v49  ;;  %v5401_v13 = vadd.f32 %v3644_v0, %v5312_v48  ;;  %v433_v16 = vpop.f32.mrb[11].mxu0  ;;  %v5432_v49 = vpack.c.bf16 %v948_v7, %v947_v6  ;;  %v952_v58 = vld [vmem:[%s6917_s3 + $0x48] sm:$0xff]  ;;  %v3156_v7 = vld [vmem:[%s6917_s3 + $0x250] sm:$0xff] }
 0x11c   : > { %4703 = vrcp.f32 %v625_v62  ;;  %v5412_v20 = vadd.f32 %v5312_v48, %v433_v16  ;;  %v5444_v6 = vpack.c.bf16 %v3153_v28, %v3152_v22  ;;  %v953_v22 = vld [vmem:[%s6917_s3 + $0x50] sm:$0xff]  ;;  %v954_v28 = vld [vmem:[%s6917_s3 + $0x58] sm:$0xff]  ;;  %v5486_v10 = vpack.c.bf16 %v952_v58, %v951_v56 }
 0x11d   : > { %v4690_v31 = vpop.eup %4689  ;;  %4705 = vrcp.f32 %v624_v8  ;;  %v3046_v37 = vmul.f32 -1.442695, %v5401_v13 }
 0x11e   : > { %v4692_v62 = vpop.eup %4691  ;;  %v627_v0 = vadd.f32 1.0, %v4690_v31  ;;  %4707 = vpow2.f32 %v3043_v63  ;;  %v3045_v8 = vmul.f32 -1.442695, %v5412_v20  ;;  %v3647_v16 = vpop.f32.mrb[12].mxu0  ;;  %v5455_v63 = vpack.c.bf16 %v950_v18, %v949_v17 }
 0x11f   : > { %v626_v30 = vadd.f32 1.0, %v4692_v62  ;;  %4709 = vpow2.f32 %v3046_v37  ;;  %v5453_v15 = vadd.f32 %v3647_v16, %v5312_v48  ;;  %v443_v31 = vpop.f32.mrb[13].mxu0  ;;  %v7027_v37 = vmov 0  ;;  %v3158_v16 = vld [vmem:[%s6917_s3 + $0x260] sm:$0xff] }
 0x120   : > { %v7028_v37 = vsel %vm5467_vm11, 4294967295, %v7027_v37  ;;  %4711 = vrcp.f32 %v627_v0  ;;  %v5472_v17 = vadd.f32 %v5312_v48, %v443_v31  ;;  %v5475_v18 = vadd.s32 8, %v5290_v42  ;;  %v955_v42 = vld [vmem:[%s6917_s3 + $0x60] sm:$0xff] }
 0x121   : > { %7029 = vst [vmem:[#allocation20_spill] sm:$0xff] %v7028_v37  ;;  %v5477_v62 = vpack.c.bf16 %v3155_v55, %v3154_v19  ;;  %v4694_v9 = vpop.eup %4693  ;;  %4713 = vrcp.f32 %v626_v30  ;;  %v3048_v0 = vmul.f32 -1.442695, %v5453_v15  ;;  %v5488_v31 = vpack.c.bf16 %v3157_v29, %v3156_v7  ;;  %v956_v19 = vld [vmem:[%s6917_s3 + $0x68] sm:$0xff]  ;;  %v3160_v55 = vld [vmem:[%s6917_s3 + $0x270] sm:$0xff] }
 0x122   : > { %v4696_v3 = vpop.eup %4695  ;;  %v7030_v29 = vmov 0  ;;  %v629_v30 = vadd.f32 1.0, %v4694_v9  ;;  %4715 = vpow2.f32 %v3045_v8  ;;  %v3047_v56 = vmul.f32 -1.442695, %v5472_v17  ;;  %v3650_v58 = vpop.f32.mrb[14].mxu0 }
 0x123   : > { %v7031_v29 = vsel %vm5503_vm12, 4294967295, %v7030_v29  ;;  %v5508_v7 = vpack.c.bf16 %v954_v28, %v953_v22  ;;  %v4698_v11 = vpop.eup %4697  ;;  %v5517_v61 = vmul.f32 %v4696_v3, %v5315_v50  ;;  %4717 = vpow2.f32 %v3048_v0  ;;  %v453_v8 = vpop.f32.mrb[15].mxu0  ;;  %v958_v28 = vld [vmem:[%s6917_s3 + $0x78] sm:$0xff]  ;;  %v3162_v3 = vld [vmem:[%s6917_s3 + $0x280] sm:$0xff]  ;;  %v3163_v50 = vld [vmem:[%s6917_s3 + $0x288] sm:$0xff] }
 0x124   : > { %7032 = vst [vmem:[#allocation21_spill] sm:$0xff] %v7031_v29  ;;  %v5522_v9 = vadd.f32 %v3650_v58, %v5312_v48  ;;  %v5524_v22 = vpack.c.bf16 %v3159_v23, %v3158_v16  ;;  %v4700_v46 = vpop.eup %4699  ;;  %v5536_v0 = vmul.f32 %v4698_v11, %v5318_v52  ;;  %v7035_v23 = vmov 0  ;;  %v3099_v52 = vld [vmem:[%s6917_s3 + $0x108] sm:$0xff] }
 0x125   : > { %7033 = vst [vmem:[#allocation22_spill] sm:$0xff] %v5517_v61  ;;  %v7036_v23 = vsel %vm5542_vm15, 4294967295, %v7035_v23  ;;  %4719 = vrcp.f32 %v629_v30  ;;  %v5547_v16 = vadd.f32 %v5312_v48, %v453_v8  ;;  %v5549_v58 = vpack.c.bf16 %v956_v19, %v955_v42  ;;  %v4702_v11 = vpop.eup %4701 }
 0x126   : > { %7034 = vst [vmem:[#allocation23_spill] sm:$0xff] %v5536_v0  ;;  %7037 = vst [vmem:[#allocation24_spill] sm:$0xff] %v7036_v23  ;;  %v628_v39 = vadd.f32 1.0, %v4700_v46  ;;  %4721 = vpow2.f32 %v3047_v56  ;;  %v3050_v30 = vmul.f32 -1.442695, %v5522_v9  ;;  %v5560_v8 = vpack.c.bf16 %v3161_v4, %v3160_v55  ;;  %v4704_v42 = vpop.eup %4703  ;;  %v3653_v33 = vpop.f32.mrb[16].mxu0 }
 0x127   : > { %v5565_v19 = vsel %vm5467_vm11, %v5517_v61, 0.0  ;;  %v631_v40 = vadd.f32 1.0, %v4702_v11  ;;  %v7038_v46 = vmov 0  ;;  %v5575_v56 = vpack.c.bf16 %v958_v28, %v957_v60  ;;  %v4706_v55 = vpop.eup %4705  ;;  %v463_v60 = vpop.f32.mrb[17].mxu0 }
 0x128   : > { %v7039_v46 = vsel %vm5571_vm6, 4294967295, %v7038_v46  ;;  %v5577_v4 = vpack.c.bf16 %v3163_v50, %v3162_v3  ;;  %v5582_v34 = vsel %vm5542_vm15, %v5536_v0, 0.0  ;;  %v5585_v11 = vmul.f32 %v4704_v42, %v5323_v57  ;;  %v4708_v3 = vpop.eup %4707 }
 0x129   : > { %7040 = vst [vmem:[#allocation25_spill] sm:$0xff] %v7039_v46  ;;  %7041 = vst [vmem:[#allocation26_spill] sm:$0xff] %v5575_v56  ;;  %4723 = vrcp.f32 %v628_v39  ;;  %v5595_v28 = vpack.c.bf16 %v3099_v52, %v3098_v53  ;;  %v714_v50 = vmul.f32 %v4706_v55, %v5326_v59  ;;  %v3049_v61 = vmul.f32 -1.442695, %v5547_v16  ;;  %v4710_v42 = vpop.eup %4709 }
 0x12a   : > { %7042 = vst [vmem:[#allocation27_spill] sm:$0xff] %v5577_v4  ;;  %7043 = vst [vmem:[#allocation28_spill] sm:$0xff] %v5585_v11  ;;  %4725 = vrcp.f32 %v631_v40  ;;  %v5600_v57 = vadd.f32 %v3653_v33, %v5312_v48  ;;  %v985_v37 = vrot.slane %v5565_v19, 1  ;;  %v630_v45 = vadd.f32 1.0, %v4708_v3  ;;  %3872 = vmatprep.mubr.msk.f32.mxu1 %vm5571_vm6, %v5585_v11  ;;  %v4712_v39 = vpop.eup %4711  ;;  %v3656_v52 = vpop.f32.mrb[18].mxu0 }
 0x12b   : > { %7046 = vst [vmem:[#allocation29_spill] sm:$0xff] %v5595_v28  ;;  %4727 = vpow2.f32 %v3050_v30  ;;  %v5604_v23 = vadd.f32 %v5312_v48, %v463_v60  ;;  %v5611_v40 = vsel %vm5591_vm7, %v714_v50, 0.0  ;;  %v633_v53 = vadd.f32 1.0, %v4710_v42  ;;  %v4714_v30 = vpop.eup %4713  ;;  %v473_v3 = vpop.f32.mrb[19].mxu0 }
 0x12c   : > { %4729 = vpow2.f32 %v3049_v61  ;;  %v3052_v59 = vmul.f32 -1.442695, %v5600_v57  ;;  %v984_v55 = vrot.slane %v5582_v34, 1  ;;  %v717_v47 = vmul.f32 %v4712_v39, %v5331_v1  ;;  %v4716_v50 = vpop.eup %4715 }
 0x12d   : > { %4731 = vrcp.f32 %v630_v45  ;;  %v5627_v60 = vsel %vm5571_vm6, %v5585_v11, 0.0  ;;  %v987_v61 = vrot.slane %v5611_v40, 1  ;;  %v5632_v42 = vmul.f32 %v4714_v30, %v5334_v5  ;;  %v4718_v28 = vpop.eup %4717 }
 0x12e   : > { %4733 = vrcp.f32 %v633_v53  ;;  %v5636_v1 = vsel %vm5617_vm8, %v717_v47, 0.0  ;;  %v632_v45 = vadd.f32 1.0, %v4716_v50  ;;  %v3051_v39 = vmul.f32 -1.442695, %v5604_v23 }
 0x12f   : > { %7049 = vst [vmem:[#allocation30_spill] sm:$0xff] %v5632_v42  ;;  %4735 = vpow2.f32 %v3052_v59  ;;  %v4720_v46 = vpop.eup %4719  ;;  %v5643_v0 = vsel %vm5503_vm12, %v5632_v42, 0.0  ;;  %v7050_v5 = vmov 0  ;;  %v635_v33 = vadd.f32 1.0, %v4718_v28  ;;  %v3659_v59 = vpop.f32.mrb[20].mxu0  ;;  %3873 = vmatmul.mubr.msk.f32.vlgmr.msra.gmra.mrb[0].mxu1 %vm5503_vm12, %v5632_v42 }
 0x130   : > { %v7051_v5 = vsel %vm5649_vm9, 4294967295, %v7050_v5  ;;  %vm761_vm7 = vcmp.ge.s32.totalorder %v5380_v51, 1  ;;  %vm771_vm8 = vcmp.le.s32.totalorder %v5380_v51, 16  ;;  %v989_v53 = vrot.slane %v5627_v60, 1  ;;  %v4722_v30 = vpop.eup %4721  ;;  %v483_v50 = vpop.f32.mrb[21].mxu0  ;;  %4339 = vmatpush3.bf16.msra.mxu1 %v5272_v26 }
 0x131   : > { %7052 = vst [vmem:[#allocation31_spill] sm:$0xff] %v7051_v5  ;;  %v5660_v47 = vmul.f32 %v4720_v46, %v5342_v12  ;;  %4737 = vrcp.f32 %v632_v45  ;;  %v5663_v25 = vadd.f32 %v3656_v52, %v5312_v48  ;;  %v986_v28 = vsel %vm6938_vm0, %v984_v55, %v985_v37  ;;  %4341 = vmatprep.subr.bf16.mxu1 %v5392_v2 }
 0x132   : > { %v7054_v11 = vmov 0  ;;  %4739 = vrcp.f32 %v635_v33  ;;  %v634_v12 = vadd.f32 1.0, %v4722_v30  ;;  %3704 = vmatprep.mubr.f32.mxu0 %v986_v28  ;;  %v5676_v46 = vadd.f32 %v5312_v48, %v473_v3 }
 0x133   : > { %7053 = vst [vmem:[#allocation32_spill] sm:$0xff] %v5660_v47  ;;  %v7055_v11 = vsel %vm5671_vm13, 4294967295, %v7054_v11  ;;  %v5679_v52 = vadd.f32 %v3659_v59, %v5312_v48  ;;  %v4724_v26 = vpop.eup %4723  ;;  %4741 = vpow2.f32 %v3051_v39  ;;  %v3054_v55 = vmul.f32 -1.442695, %v5663_v25  ;;  %v3662_v39 = vpop.f32.mrb[22].mxu0 }
 0x134   : > { %7056 = vst [vmem:[#allocation33_spill] sm:$0xff] %v7055_v11  ;;  %v988_v27 = vsel %vm6938_vm0, %v985_v37, %v987_v61  ;;  %v5685_v45 = vadd.f32 %v5312_v48, %v483_v50  ;;  %v7057_v3 = vmov 0  ;;  %v4726_v33 = vpop.eup %4725  ;;  %v5696_v59 = vmul.f32 %v4724_v26, %v5345_v14  ;;  %4343 = vmatpush3.bf16.msra.mxu1 %v5392_v2 }
 0x135   : > { %v7058_v3 = vsel %vm5691_vm14, 4294967295, %v7057_v3  ;;  %4743 = vrcp.f32 %v634_v12  ;;  %v3053_v37 = vmul.f32 -1.442695, %v5676_v46  ;;  %v3056_v61 = vmul.f32 -1.442695, %v5679_v52  ;;  %3705 = vmatmul.mubr.f32.vlgmr.msra.gmra.mrb[30].mxu0 %v988_v27  ;;  %v4728_v30 = vpop.eup %4727  ;;  %v493_v12 = vpop.f32.mrb[23].mxu0  ;;  %4345 = vmatprep.subr.bf16.mxu1 %v5417_v36 }
 0x136   : > { %v5703_v28 = vmul.f32 %v4726_v33, %v5354_v41  ;;  %4745 = vpow2.f32 %v3054_v55  ;;  %v3055_v50 = vmul.f32 -1.442695, %v5685_v45  ;;  %v5707_v14 = vadd.f32 %v3662_v39, %v5312_v48  ;;  %4243 = vmatpush3.bf16.msra.mxu0 %v5280_v32  ;;  %v4730_v41 = vpop.eup %4729  ;;  %3875 = vmatprep.mubr.msk.f32.mxu1 %vm5691_vm14, %v5696_v59  ;;  %v3665_v42 = vpop.f32.mrb[24].mxu0 }
 0x137   : > { %v7061_v26 = vmov 0  ;;  %v637_v55 = vadd.f32 1.0, %v4728_v30  ;;  %4747 = vpow2.f32 %v3053_v37  ;;  %v990_v27 = vrot.slane %v5643_v0, 1  ;;  %4245 = vmatprep.subr.bf16.mxu0 %v5403_v21  ;;  %v4732_v39 = vpop.eup %4731  ;;  %3876 = vmatmul.mubr.msk.f32.gmra.mrb[2].mxu1 %vm5649_vm9, %v5660_v47 }
 0x138   : > { %7059 = vst [vmem:[#allocation34_spill] sm:$0xff] %v5703_v28  ;;  %7060 = vst [vmem:[#allocation35_spill] sm:$0xff] %v5707_v14  ;;  %v7062_v26 = vsel %vm5713_vm1, 4294967295, %v7061_v26  ;;  %v5724_v33 = vadd.f32 %v5312_v48, %v493_v12  ;;  %v636_v2 = vadd.f32 1.0, %v4730_v41  ;;  %4749 = vpow2.f32 %v3056_v61  ;;  %v4734_v30 = vpop.eup %4733  ;;  %3878 = vmatprep.mubr.msk.f32.mxu1 %vm5713_vm1, %v5703_v28  ;;  %4347 = vmatpush3.bf16.msra.mxu1 %v5417_v36 }
 0x139   : > { %7063 = vst [vmem:[#allocation36_spill] sm:$0xff] %v7062_v26  ;;  %v3058_v37 = vmul.f32 -1.442695, %v5707_v14  ;;  %v720_v12 = vmul.f32 %v4732_v39, %v5363_v24  ;;  %4751 = vrcp.f32 %v637_v55  ;;  %v5751_v61 = vsel %vm6938_vm0, %v989_v53, %v990_v27  ;;  %v4736_v24 = vpop.eup %4735  ;;  %4349 = vmatprep.subr.bf16.mxu1 %v5444_v6 }
 0x13a   : > { %7064 = vst [vmem:[#allocation37_spill] sm:$0xff] %v5724_v33  ;;  %v3057_v41 = vmul.f32 -1.442695, %v5724_v33  ;;  %v723_v39 = vmul.f32 %v4734_v30, %v5401_v13  ;;  %4753 = vrcp.f32 %v636_v2  ;;  %3707 = vmatprep.mubr.f32.mxu0 %v5751_v61  ;;  %v7069_v4 = vrot.slane %v5636_v1, 1  ;;  %v503_v33 = vpop.f32.mrb[25].mxu0  ;;  %4247 = vmatpush3.bf16.msra.mxu0 %v5403_v21 }
 0x13b   : > { %v5765_v53 = vadd.f32 %v3665_v42, %v5312_v48  ;;  %v5770_v56 = vsel %vm5732_vm2, %v720_v12, 0.0  ;;  %v639_v14 = vadd.f32 1.0, %v4736_v24  ;;  %4755 = vpow2.f32 %v3055_v50  ;;  %4249 = vmatprep.subr.bf16.mxu0 %v5432_v49  ;;  %vm5788_vm2 = vmand %vm761_vm7, %vm771_vm8  ;;  %v3668_v30 = vpop.f32.mrb[26].mxu0 }
 0x13c   : > { %v5762_v55 = vsel %vm6938_vm0, %v990_v27, %v7069_v4  ;;  %v5776_v13 = vsel %vm5691_vm14, %v5696_v59, 0.0  ;;  %v4738_v4 = vpop.eup %4737  ;;  %v5782_v21 = vsel %vm5746_vm10, %v723_v39, 0.0  ;;  %v7070_v50 = vmov 0  ;;  %v513_v39 = vpop.f32.mrb[27].mxu0  ;;  %4351 = vmatpush3.bf16.msra.mxu1 %v5444_v6 }
 0x13d   : > { %3708 = vmatmul.mubr.f32.gmra.mrb[32].mxu0 %v5762_v55  ;;  %v7071_v50 = vsel %vm5788_vm2, 4294967295, %v7070_v50  ;;  %4757 = vpow2.f32 %v3058_v37  ;;  %v5795_v27 = vsel %vm5649_vm9, %v5660_v47, 0.0  ;;  %v4740_v32 = vpop.eup %4739  ;;  %v997_v29 = vrot.slane %v5770_v56, 1  ;;  %4353 = vmatprep.subr.bf16.mxu1 %v5477_v62 }
 0x13e   : > { %v5800_v2 = vmul.f32 %v4738_v4, %v5412_v20  ;;  %4759 = vrcp.f32 %v639_v14  ;;  %v4742_v37 = vpop.eup %4741  ;;  %v3060_v24 = vmul.f32 -1.442695, %v5765_v53  ;;  %v994_v36 = vrot.slane %v5776_v13, 1  ;;  %4251 = vmatpush3.bf16.msra.mxu0 %v5432_v49 }
 0x13f   : > { %4761 = vpow2.f32 %v3057_v41  ;;  %v4744_v42 = vpop.eup %4743  ;;  %v638_v20 = vadd.f32 1.0, %v4742_v37  ;;  %v995_v14 = vrot.slane %v5795_v27, 1  ;;  %v5810_v4 = vadd.f32 %v5312_v48, %v503_v33  ;;  %4253 = vmatprep.subr.bf16.mxu0 %v5455_v63 }
 0x140   : > { %7072 = vst [vmem:[#allocation38_spill] sm:$0xff] %v5800_v2  ;;  %v5813_v51 = vadd.f32 %v3668_v30, %v5312_v48  ;;  %3879 = vmatmul.mubr.msk.f32.gmra.mrb[4].mxu1 %vm5671_vm13, %v5800_v2  ;;  %vm7073_vm10 = vcmp.ge.s32.totalorder %v5287_v38, 1  ;;  %v7074_v49 = vmov 0  ;;  %v4746_v41 = vpop.eup %4745  ;;  %v5828_v33 = vmul.f32 %v4740_v32, %v5453_v15 }
 0x141   : > { %vm5822_vm7 = vmand %vm5788_vm2, %vm7073_vm10  ;;  %v5831_v30 = vmul.f32 %v4744_v42, %v5472_v17  ;;  %vm7076_vm8 = vcmp.le.s32.totalorder %v5383_v54, 16  ;;  %v7078_v37 = vmov 0  ;;  %4763 = vpow2.f32 %v3060_v24  ;;  %v4748_v15 = vpop.eup %4747  ;;  %v3671_v54 = vpop.f32.mrb[28].mxu0  ;;  %4355 = vmatpush3.bf16.msra.mxu1 %v5477_v62 }
 0x142   : > { %v7075_v49 = vsel %vm5822_vm7, 4294967295, %v7074_v49  ;;  %vm5837_vm0 = vmand %vm7077_vm3, %vm7076_vm8  ;;  %v5844_v12 = vadd.f32 %v5312_v48, %v513_v39  ;;  %4765 = vrcp.f32 %v638_v20  ;;  %v641_v17 = vadd.f32 1.0, %v4746_v41  ;;  %v4750_v24 = vpop.eup %4749  ;;  %v523_v20 = vpop.f32.mrb[29].mxu0  ;;  %4255 = vmatpush3.bf16.msra.mxu0 %v5455_v63  ;;  %4357 = vmatprep.subr.bf16.mxu1 %v5488_v31 }
 0x143   : > { %v7079_v37 = vsel %vm5837_vm0, 4294967295, %v7078_v37  ;;  %vm7080_vm14 = vcmask 1046528   ;;  %v5853_v32 = vsel %vm5713_vm1, %v5703_v28, 0.0  ;;  %v640_v5 = vadd.f32 1.0, %v4748_v15  ;;  %3881 = vmatprep.mubr.msk.f32.mxu1 %vm5822_vm7, %v5831_v30  ;;  %v4752_v41 = vpop.eup %4751  ;;  %4257 = vmatprep.subr.bf16.mxu0 %v5486_v10 }
 0x144   : > { %v5848_v42 = vsel %vm7080_vm14, %v994_v36, %v995_v14  ;;  %v3059_v6 = vmul.f32 -1.442695, %v5810_v4  ;;  %v3062_v36 = vmul.f32 -1.442695, %v5813_v51  ;;  %v5862_v39 = vsel %vm7080_vm14, %v995_v14, %v997_v29  ;;  %3882 = vmatmul.mubr.msk.f32.gmra.mrb[6].mxu1 %vm5788_vm2, %v5828_v33  ;;  %vm7083_vm14 = vmmov %vm7073_vm10  ;;  %v4754_v14 = vpop.eup %4753  ;;  %v3223_v29 = vld [vmem:[%s6917_s3 + $0x3e8] sm:$0xff] }
 0x145   : > { %7081 = vst [vmem:[#allocation39_spill] sm:$0xff] %v5848_v42  ;;  %3710 = vmatprep.mubr.f32.mxu0 %v5848_v42  ;;  %7082 = vst [vmem:[#allocation40_spill] sm:$0xff] %v5862_v39  ;;  %4767 = vrcp.f32 %v641_v17  ;;  %v643_v15 = vadd.f32 1.0, %v4750_v24  ;;  %v5869_v26 = vadd.f32 %v3671_v54, %v5312_v48  ;;  %v5874_v28 = vsel %vm5671_vm13, %v5800_v2, 0.0  ;;  %v4756_v2 = vpop.eup %4755  ;;  %4359 = vmatpush3.bf16.msra.mxu1 %v5488_v31 }
 0x146   : > { %3711 = vmatmul.mubr.f32.gmra.mrb[34].mxu0 %v5862_v39  ;;  %vm5883_vm10 = vmand %vm5837_vm0, %vm7083_vm14  ;;  %v5888_v17 = vmul.f32 %v4752_v41, %v5522_v9  ;;  %vm7086_vm3 = vcmp.le.s32.totalorder %v5293_v43, 16  ;;  %4769 = vrcp.f32 %v640_v5  ;;  %v999_v24 = vrot.slane %v5853_v32, 1  ;;  %4361 = vmatprep.subr.bf16.mxu1 %v5524_v22 }
 0x147   : > { %vm5894_vm8 = vmand %vm5788_vm2, %vm7086_vm3  ;;  %v1000_v11 = vrot.slane %v5874_v28, 1  ;;  %v726_v9 = vmul.f32 %v4754_v14, %v5547_v16  ;;  %4771 = vrcp.f32 %v643_v15  ;;  %v3061_v41 = vmul.f32 -1.442695, %v5844_v12  ;;  %v4758_v5 = vpop.eup %4757  ;;  %4259 = vmatpush3.bf16.msra.mxu0 %v5486_v10 }
 0x148   : > { %v5905_v47 = vadd.f32 %v5312_v48, %v523_v20  ;;  %v642_v39 = vadd.f32 1.0, %v4756_v2  ;;  %4773 = vpow2.f32 %v3059_v6  ;;  %vm7089_vm3 = vcmask 1046528   ;;  %3884 = vmatprep.mubr.msk.f32.mxu1 %vm5883_vm10, %v5888_v17  ;;  %v4760_v48 = vpop.eup %4759  ;;  %4261 = vmatprep.subr.bf16.mxu0 %v5508_v7 }
 0x149   : > { %v5910_v63 = vsel %vm7089_vm3, %v999_v24, %v1000_v11  ;;  %v7090_v62 = vrot.slane %v5782_v21, 1  ;;  %vm7091_vm14 = vmmov %vm7089_vm3  ;;  %v5922_v20 = vsel %vm5894_vm8, %v726_v9, 0.0  ;;  %vm7092_vm9 = vcmp.le.s32.totalorder %v5293_v43, 16  ;;  %v4762_v15 = vpop.eup %4761  ;;  %4363 = vmatpush3.bf16.msra.mxu1 %v5524_v22 }
 0x14a   : > { %vm5928_vm3 = vmand %vm5837_vm0, %vm7092_vm9  ;;  %v645_v6 = vadd.f32 1.0, %v4758_v5  ;;  %4775 = vpow2.f32 %v3062_v36  ;;  %3713 = vmatprep.mubr.f32.mxu0 %v5910_v63  ;;  %v1007_v14 = vrot.slane %v5922_v20, 1  ;;  %v729_v54 = vmul.f32 %v4760_v48, %v5600_v57  ;;  %4365 = vmatprep.subr.bf16.mxu1 %v5560_v8 }
 0x14b   : > { %v5915_v16 = vsel %vm7091_vm14, %v1000_v11, %v7090_v62  ;;  %v3064_v11 = vmul.f32 -1.442695, %v5869_v26  ;;  %4777 = vrcp.f32 %v642_v39  ;;  %v3063_v24 = vmul.f32 -1.442695, %v5905_v47  ;;  %v4764_v57 = vpop.eup %4763  ;;  %4263 = vmatpush3.bf16.msra.mxu0 %v5508_v7 }
 0x14c   : > { %3714 = vmatmul.mubr.f32.gmra.mrb[36].mxu0 %v5915_v16  ;;  %4779 = vrcp.f32 %v645_v6  ;;  %v644_v9 = vadd.f32 1.0, %v4762_v15  ;;  %v5942_v36 = vsel %vm5822_vm7, %v5831_v30, 0.0  ;;  %v5947_v5 = vsel %vm5788_vm2, %v5828_v33, 0.0  ;;  %v4766_v48 = vpop.eup %4765  ;;  %4265 = vmatprep.subr.bf16.mxu0 %v5549_v58 }
 0x14d   : > { %v5953_v31 = vsel %vm5928_vm3, %v729_v54, 0.0  ;;  %4781 = vpow2.f32 %v3061_v41  ;;  %v1004_v39 = vrot.slane %v5942_v36, 1  ;;  %v1005_v62 = vrot.slane %v5947_v5, 1  ;;  %4367 = vmatpush3.bf16.msra.mxu1 %v5560_v8 }
 0x14e   : > { %v1356_v6 = vrot.slane %v5636_v1, 2  ;;  %v1012_v10 = vrot.slane %v5953_v31, 1  ;;  %vm7095_vm9 = vcmp.le.s32.totalorder %v5415_v35, 16  ;;  %vm7096_vm8 = vcmp.ge.s32.totalorder %v5415_v35, 1 }
 0x14f   : > { %vm5965_vm14 = vmand %vm7096_vm8, %vm7095_vm9  ;;  %v7097_v2 = vmov 0  ;;  %4783 = vrcp.f32 %v644_v9  ;;  %v5970_v41 = vmul.f32 %v4766_v48, %v5604_v23  ;;  %vm7100_vm3 = vcmask 1046528   ;;  %v4768_v15 = vpop.eup %4767  ;;  %4267 = vmatpush3.bf16.msra.mxu0 %v5549_v58 }
 0x150   : > { %v7098_v2 = vsel %vm5965_vm14, 4294967295, %v7097_v2  ;;  %4785 = vpow2.f32 %v3064_v11  ;;  %v5973_v54 = vsel %vm7100_vm3, %v1004_v39, %v1005_v62  ;;  %vm7102_vm2 = vmmov %vm7100_vm3  ;;  %vm7104_vm7 = vcmp.le.s32.totalorder %v5430_v44, 16  ;;  %v4770_v39 = vpop.eup %4769 }
 0x151   : > { %7099 = vst [vmem:[#allocation41_spill] sm:$0xff] %v7098_v2  ;;  %7101 = vst [vmem:[#allocation42_spill] sm:$0xff] %v5973_v54  ;;  %v5976_v1 = vsel %vm7102_vm2, %v1005_v62, %v1007_v14  ;;  %vm7105_vm9 = vcmp.ge.s32.totalorder %v5430_v44, 1  ;;  %v7106_v35 = vmov 0  ;;  %v647_v23 = vadd.f32 1.0, %v4764_v57  ;;  %3716 = vmatprep.mubr.f32.mxu0 %v5973_v54  ;;  %3885 = vmatmul.mubr.msk.f32.gmra.mrb[8].mxu1 %vm5837_vm0, %v5970_v41 }
 0x152   : > { %7103 = vst [vmem:[#allocation43_spill] sm:$0xff] %v5976_v1  ;;  %vm5983_vm8 = vmand %vm7105_vm9, %vm7104_vm7  ;;  %v5991_v11 = vsel %vm5883_vm10, %v5888_v17, 0.0  ;;  %v7108_v22 = vrot.slane %v5565_v19, 2  ;;  %v7109_v14 = vrot.slane %v5582_v34, 2  ;;  %vm7110_vm2 = vcmask 1045504   ;;  %3717 = vmatmul.mubr.f32.gmra.mrb[38].mxu0 %v5976_v1 }
 0x153   : > { %v7107_v35 = vsel %vm5983_vm8, 4294967295, %v7106_v35  ;;  %v1354_v9 = vrot.slane %v5643_v0, 2  ;;  %v6003_v57 = vmul.f32 %v4768_v15, %v5663_v25  ;;  %4787 = vpow2.f32 %v3063_v24  ;;  %v4772_v25 = vpop.eup %4771 }
 0x154   : > { %v5999_v44 = vsel %vm7110_vm2, %v7109_v14, %v7108_v22  ;;  %v6012_v34 = vsel %vm5837_vm0, %v5970_v41, 0.0  ;;  %v1009_v7 = vrot.slane %v5991_v11, 1  ;;  %vm7113_vm7 = vcmp.ge.s32.totalorder %v5287_v38, 1  ;;  %vm7121_vm0 = vmmov %vm7110_vm2 }
 0x155   : > { %7111 = vst [vmem:[#allocation44_spill] sm:$0xff] %v5999_v44  ;;  %7112 = vst [vmem:[#allocation45_spill] sm:$0xff] %v6003_v57  ;;  %v7114_v0 = vmov 0  ;;  %v6024_v24 = vmul.f32 %v4770_v39, %v5676_v46  ;;  %v1010_v62 = vrot.slane %v6012_v34, 1  ;;  %v7116_v48 = vrot.slane %v5627_v60, 2  ;;  %v4774_v39 = vpop.eup %4773 }
 0x156   : > { %vm6019_vm3 = vmand %vm5965_vm14, %vm7113_vm7  ;;  %v7119_v22 = vrot.slane %v5611_v40, 2  ;;  %v7120_v46 = vrot.slane %v5565_v19, 2  ;;  %v6044_v44 = vmul.f32 %v4772_v25, %v5679_v52  ;;  %vm7124_vm9 = vcmp.ge.s32.totalorder %v5287_v38, 1  ;;  %v4776_v25 = vpop.eup %4775 }
 0x157   : > { %v7115_v0 = vsel %vm6019_vm3, 4294967295, %v7114_v0  ;;  %vm7117_vm7 = vmmov %vm7110_vm2  ;;  %v7125_v60 = vmov 0  ;;  %v6057_v40 = vsel %vm5965_vm14, %v6003_v57, 0.0  ;;  %v6061_v19 = vsel %vm7121_vm0, %v1354_v9, %v1356_v6  ;;  %3887 = vmatprep.mubr.msk.f32.mxu1 %vm6019_vm3, %v6024_v24 }
 0x158   : > { %v6034_v15 = vsel %vm7117_vm7, %v7116_v48, %v1354_v9  ;;  %v6041_v14 = vsel %vm7121_vm0, %v7120_v46, %v7119_v22  ;;  %7123 = vst [vmem:[#allocation48_spill] sm:$0xff] %v6044_v44  ;;  %vm6050_vm2 = vmand %vm5983_vm8, %vm7124_vm9  ;;  %v1358_v52 = vrot.slane %v5776_v13, 2  ;;  %v646_v48 = vadd.f32 1.0, %v4774_v39  ;;  %v4778_v13 = vpop.eup %4777  ;;  %3888 = vmatmul.mubr.msk.f32.gmra.mrb[10].mxu1 %vm5965_vm14, %v6003_v57 }
 0x159   : > { %7118 = vst [vmem:[#allocation46_spill] sm:$0xff] %v6034_v15  ;;  %7122 = vst [vmem:[#allocation47_spill] sm:$0xff] %v6041_v14  ;;  %v7126_v60 = vsel %vm6050_vm2, 4294967295, %v7125_v60  ;;  %vm7129_vm7 = vcmask 1046528   ;;  %v6076_v8 = vsel %vm6019_vm3, %v6024_v24, 0.0  ;;  %vm7133_vm0 = vcmp.le.s32.totalorder %v5293_v43, 16  ;;  %3890 = vmatprep.mubr.msk.f32.mxu1 %vm6050_vm2, %v6044_v44 }
 0x15a   : > { %7127 = vst [vmem:[#allocation49_spill] sm:$0xff] %v7126_v60  ;;  %7128 = vst [vmem:[#allocation50_spill] sm:$0xff] %v6061_v19  ;;  %v6065_v22 = vsel %vm7129_vm7, %v1009_v7, %v1010_v62  ;;  %4789 = vrcp.f32 %v647_v23  ;;  %v649_v9 = vadd.f32 1.0, %v4776_v25  ;;  %v1015_v58 = vrot.slane %v6057_v40, 1  ;;  %v4780_v7 = vpop.eup %4779  ;;  %v7139_v19 = vld [vmem:[#allocation35_spill] sm:$0xff] }
 0x15b   : > { %7130 = vst [vmem:[#allocation51_spill] sm:$0xff] %v6065_v22  ;;  %vm7131_vm9 = vmmov %vm7129_vm7  ;;  %3719 = vmatprep.mubr.f32.mxu0 %v6065_v22  ;;  %v732_v39 = vmul.f32 %v4778_v13, %v5685_v45  ;;  %4791 = vrcp.f32 %v646_v48  ;;  %v1359_v25 = vrot.slane %v5795_v27, 2  ;;  %v735_v45 = vmul.f32 %v4780_v7, %v7139_v19  ;;  %v7143_v48 = vld [vmem:[#allocation26_spill] sm:$0xff]  ;;  %v7144_v15 = vld [vmem:[#allocation27_spill] sm:$0xff] }
 0x15c   : > { %v6071_v46 = vsel %vm7131_vm9, %v1010_v62, %v1012_v10  ;;  %vm6083_vm7 = vmand %vm5965_vm14, %vm7133_vm0  ;;  %v1014_v10 = vrot.slane %v6076_v8, 1  ;;  %v1366_v62 = vrot.slane %v5782_v21, 2  ;;  %v4782_v21 = vpop.eup %4781  ;;  %4793 = vrcp.f32 %v649_v9  ;;  %4269 = vmatprep.subr.bf16.mxu0 %v7143_v48  ;;  %4369 = vmatprep.subr.bf16.mxu1 %v7144_v15 }
 0x15d   : > { %7132 = vst [vmem:[#allocation52_spill] sm:$0xff] %v6071_v46  ;;  %vm7136_vm9 = vmmov %vm7133_vm0  ;;  %3720 = vmatmul.mubr.f32.gmra.mrb[40].mxu0 %v6071_v46  ;;  %vm7140_vm14 = vcmask 1046528   ;;  %v6115_v14 = vsel %vm6050_vm2, %v6044_v44, 0.0  ;;  %v4784_v2 = vpop.eup %4783  ;;  %v933_v27 = vsel %vm6083_vm7, %v732_v39, 0.0  ;;  %v648_v57 = vadd.f32 1.0, %v4782_v21  ;;  %v7150_v39 = vld [vmem:[#allocation37_spill] sm:$0xff] }
 0x15e   : > { %vm6099_vm0 = vmand %vm5983_vm8, %vm7136_vm9  ;;  %v6110_v13 = vsel %vm7140_vm14, %v1014_v10, %v1015_v58  ;;  %7142 = vst [vmem:[#allocation53_spill] sm:$0xff] %v6115_v14  ;;  %4271 = vmatpush3.bf16.msra.mxu0 %v7143_v48  ;;  %vm7145_vm14 = vcmask 1045504   ;;  %v7146_v9 = vrot.slane %v5770_v56, 2  ;;  %v4786_v7 = vpop.eup %4785  ;;  %v1371_v60 = vrot.slane %v5922_v20, 2  ;;  %v7151_v48 = vld [vmem:[#allocation29_spill] sm:$0xff] }
 0x15f   : > { %7141 = vst [vmem:[#allocation35_spill] sm:$0xff] %v6110_v13  ;;  %3722 = vmatprep.mubr.f32.mxu0 %v6110_v13  ;;  %v6124_v19 = vsel %vm7145_vm14, %v1358_v52, %v1359_v25  ;;  %vm7147_vm9 = vmmov %vm7145_vm14  ;;  %v1017_v44 = vrot.slane %v933_v27, 1  ;;  %v6134_v6 = vsel %vm6099_vm0, %v735_v45, 0.0  ;;  %v6137_v21 = vmul.f32 %v4784_v2, %v7150_v39  ;;  %4273 = vmatprep.subr.bf16.mxu0 %v7151_v48 }
 0x160   : > { %v6129_v10 = vsel %vm7147_vm9, %v1359_v25, %v7146_v9  ;;  %7149 = vst [vmem:[#allocation27_spill] sm:$0xff] %v6134_v6  ;;  %v1022_v52 = vrot.slane %v6134_v6, 1  ;;  %4795 = vrcp.f32 %v648_v57  ;;  %v651_v56 = vadd.f32 1.0, %v4786_v7  ;;  %v4788_v9 = vpop.eup %4787 }
 0x161   : > { %7148 = vst [vmem:[#allocation26_spill] sm:$0xff] %v6129_v10  ;;  %v1019_v25 = vrot.slane %v6115_v14, 1  ;;  %vm7152_vm7 = vcmask 1046528   ;;  %3891 = vmatmul.mubr.msk.f32.gmra.mrb[12].mxu1 %vm5983_vm8, %v6137_v21  ;;  %v6151_v20 = vsel %vm5983_vm8, %v6137_v21, 0.0  ;;  %v1363_v2 = vrot.slane %v5853_v32, 2 }
 0x162   : > { %v6143_v10 = vsel %vm7152_vm7, %v1015_v58, %v1017_v44  ;;  %v1364_v57 = vrot.slane %v5874_v28, 2  ;;  %4797 = vrcp.f32 %v651_v56  ;;  %v650_v23 = vadd.f32 1.0, %v4788_v9 }
 0x163   : > { %7153 = vst [vmem:[#allocation37_spill] sm:$0xff] %v6143_v10  ;;  %3723 = vmatmul.mubr.f32.gmra.mrb[42].mxu0 %v6143_v10  ;;  %v1020_v44 = vrot.slane %v6151_v20, 1  ;;  %v1368_v58 = vrot.slane %v5942_v36, 2  ;;  %v1376_v45 = vrot.slane %v5953_v31, 2  ;;  %vm7154_vm0 = vcmp.le.s32.totalorder %v5475_v18, 16 }
 0x164   : > { %vm7155_vm14 = vcmp.ge.s32.totalorder %v5475_v18, 1  ;;  %vm7158_vm7 = vcmask 1045504   ;;  %v1369_v39 = vrot.slane %v5947_v5, 2  ;;  %v1381_v56 = vrot.slane %v933_v27, 2  ;;  %v4790_v18 = vpop.eup %4789 }
 0x165   : > { %vm6163_vm9 = vmand %vm7155_vm14, %vm7154_vm0  ;;  %v6168_v28 = vsel %vm7158_vm7, %v1363_v2, %v1364_v57  ;;  %4799 = vrcp.f32 %v650_v23  ;;  %vm7160_vm2 = vcmask 1046528   ;;  %v1374_v5 = vrot.slane %v6012_v34, 2  ;;  %v4792_v27 = vpop.eup %4791 }
 0x166   : > { %vm7159_vm8 = vmmov %vm7158_vm7  ;;  %v6175_v36 = vsel %vm7160_vm2, %v1019_v25, %v1020_v44  ;;  %v1378_v34 = vrot.slane %v6076_v8, 2  ;;  %v1379_v25 = vrot.slane %v6057_v40, 2  ;;  %v6207_v23 = vmul.f32 %v4792_v27, %v5810_v4 }
 0x167   : > { %v6171_v32 = vsel %vm7159_vm8, %v1364_v57, %v1366_v62  ;;  %7161 = vst [vmem:[#allocation29_spill] sm:$0xff] %v6175_v36  ;;  %vm7162_vm3 = vmmov %vm7160_vm2  ;;  %3725 = vmatprep.mubr.f32.mxu0 %v6175_v36  ;;  %v1373_v62 = vrot.slane %v5991_v11, 2  ;;  %vm7166_vm8 = vcmp.ge.s32.totalorder %v5287_v38, 1  ;;  %v3101_v11 = vld [vmem:[%s6917_s3 + $0x118] sm:$0xff]  ;;  %v4794_v57 = vpop.eup %4793  ;;  %v6219_v14 = vmul.f32 %v4790_v18, %v5765_v53  ;;  %v3164_v53 = vld [vmem:[%s6917_s3 + $0x290] sm:$0xff] }
 0x168   : > { %v6178_v31 = vsel %vm7162_vm3, %v1020_v44, %v1022_v52  ;;  %vm7164_vm0 = vmmov %vm7158_vm7  ;;  %v7169_v44 = vld [vmem:[#allocation23_spill] sm:$0xff]  ;;  %v6222_v8 = vmul.f32 %v4794_v57, %v5813_v51  ;;  %v3165_v51 = vld [vmem:[%s6917_s3 + $0x298] sm:$0xff] }
 0x169   : > { %7163 = vst [vmem:[#allocation54_spill] sm:$0xff] %v6178_v31  ;;  %v6182_v9 = vsel %vm7164_vm0, %v1368_v58, %v1369_v39  ;;  %vm7165_vm14 = vmmov %vm7164_vm0  ;;  %3726 = vmatmul.mubr.f32.gmra.mrb[44].mxu0 %v6178_v31  ;;  %v6225_v40 = vsel %vm7164_vm0, %v1378_v34, %v1379_v25  ;;  %v7182_v34 = vld [vmem:[#allocation28_spill] sm:$0xff]  ;;  %v3166_v57 = vld [vmem:[%s6917_s3 + $0x2a0] sm:$0xff] }
 0x16a   : > { %v6185_v2 = vsel %vm7165_vm14, %v1369_v39, %v1371_v60  ;;  %vm6193_vm3 = vmand %vm6163_vm9, %vm7166_vm8  ;;  %v3100_v60 = vld [vmem:[%s6917_s3 + $0x110] sm:$0xff]  ;;  %3760 = vmatprep.mubr.msk.f32.mxu0 %vm5542_vm15, %v7169_v44  ;;  %7173 = vst [vmem:[#allocation23_spill] sm:$0xff] %v6225_v40  ;;  %v4796_v38 = vpop.eup %4795  ;;  %v3102_v58 = vld [vmem:[%s6917_s3 + $0x120] sm:$0xff] }
 0x16b   : > { %vm7171_vm2 = vmmov %vm7164_vm0  ;;  %3893 = vmatprep.mubr.msk.f32.mxu1 %vm6193_vm3, %v6207_v23  ;;  %v7240_v52 = vld [vmem:[#allocation52_spill] sm:$0xff] }
 0x16c   : > { %v6213_v39 = vsel %vm7171_vm2, %v1373_v62, %v1374_v5  ;;  %vm7172_vm7 = vmmov %vm7164_vm0  ;;  %v7177_v62 = vmov 0  ;;  %vm7179_vm2 = vcmp.le.s32.totalorder %v5293_v43, 16  ;;  %3894 = vmatmul.mubr.msk.f32.gmra.mrb[14].mxu1 %vm6163_vm9, %v6219_v14 }
 0x16d   : > { %v6216_v6 = vsel %vm7172_vm7, %v1374_v5, %v1376_v45  ;;  %vm7174_vm14 = vmmov %vm7164_vm0  ;;  %v4276_v45 = vpack.c.bf16 %v3101_v11, %v3100_v60  ;;  %v738_v5 = vmul.f32 %v4796_v38, %v5844_v12  ;;  %3928 = vmatprep.mubr.f32.mxu1 %v5751_v61  ;;  %v4798_v11 = vpop.eup %4797  ;;  %v3167_v12 = vld [vmem:[%s6917_s3 + $0x2a8] sm:$0xff] }
 0x16e   : > { %v6228_v4 = vsel %vm7174_vm14, %v1379_v25, %v1381_v56  ;;  %vm7175_vm15 = vmmov %vm7166_vm8  ;;  %v7180_v56 = vld [vmem:[#allocation22_spill] sm:$0xff]  ;;  %v4372_v25 = vpack.c.bf16 %v3165_v51, %v3164_v53  ;;  %v741_v61 = vmul.f32 %v4798_v11, %v5869_v26  ;;  %v3105_v11 = vld [vmem:[%s6917_s3 + $0x138] sm:$0xff] }
 0x16f   : > { %vm6234_vm8 = vmand %vm5297_vm4, %vm7175_vm15  ;;  %3761 = vmatmul.mubr.msk.f32.vlgmr.msra.gmra.mrb[30].mxu0 %vm5467_vm11, %v7180_v56  ;;  %v4800_v53 = vpop.eup %4799  ;;  %v7184_v51 = vld [vmem:[#allocation30_spill] sm:$0xff]  ;;  %vm7187_vm11 = vnez %v7058_v3  ;;  %vm7203_vm15 = vnez %v7075_v49 }
 0x170   : > { %v7178_v62 = vsel %vm6234_vm8, 4294967295, %v7177_v62  ;;  %vm849_vm7 = vmand %vm6163_vm9, %vm7179_vm2  ;;  %3763 = vmatprep.mubr.msk.f32.mxu0 %vm5571_vm6, %v7182_v34  ;;  %v940_v43 = vsel %vm6234_vm8, %v6222_v8, 0.0  ;;  %4275 = vmatpush3.bf16.msra.mxu0 %v7151_v48  ;;  %v3103_v48 = vld [vmem:[%s6917_s3 + $0x128] sm:$0xff]  ;;  %v942_v56 = vsel %vm5305_vm5, %v741_v61, 0.0  ;;  %v6288_v18 = vmul.f32 %v4800_v53, %v5905_v47  ;;  %v3169_v47 = vld [vmem:[%s6917_s3 + $0x2b8] sm:$0xff] }
 0x171   : > { %v6269_v44 = vsel %vm849_vm7, %v738_v5, 0.0  ;;  %4277 = vmatprep.subr.bf16.mxu0 %v4276_v45  ;;  %3929 = vmatmul.mubr.f32.vlgmr.msra.gmra.mrb[0].mxu1 %v5762_v55  ;;  %v3168_v5 = vld [vmem:[%s6917_s3 + $0x2b0] sm:$0xff]  ;;  %v2317_v34 = vrot.slane %v942_v56, 1  ;;  %v4376_v55 = vpack.c.bf16 %v3167_v12, %v3166_v57  ;;  %v4280_v60 = vpack.c.bf16 %v3103_v48, %v3102_v58  ;;  %vm7199_vm14 = vmmov %vm7164_vm0 }
 0x172   : > { %4371 = vmatpush3.bf16.msra.mxu1 %v7144_v15  ;;  %3931 = vmatprep.mubr.f32.mxu1 %v5848_v42  ;;  %v3104_v15 = vld [vmem:[%s6917_s3 + $0x130] sm:$0xff]  ;;  %v2502_v61 = vrot.slane %v942_v56, 2  ;;  %v941_v53 = vsel %vm5297_vm4, %v6288_v18, 0.0  ;;  %v2314_v38 = vrot.slane %v940_v43, 1  ;;  %v2499_v26 = vrot.slane %v940_v43, 2  ;;  %v7197_v43 = vld [vmem:[#allocation34_spill] sm:$0xff] }
 0x173   : > { %3764 = vmatmul.mubr.msk.f32.gmra.mrb[32].mxu0 %vm5503_vm12, %v7184_v51  ;;  %4373 = vmatprep.subr.bf16.mxu1 %v4372_v25  ;;  %v2315_v57 = vrot.slane %v941_v53, 1  ;;  %v2500_v12 = vrot.slane %v941_v53, 2  ;;  %v7188_v58 = vld [vmem:[#allocation40_spill] sm:$0xff]  ;;  %v7190_v51 = vld [vmem:[#allocation31_spill] sm:$0xff]  ;;  %v4380_v42 = vpack.c.bf16 %v3169_v47, %v3168_v5  ;;  %v4284_v56 = vpack.c.bf16 %v3105_v11, %v3104_v15  ;;  %v3106_v47 = vld [vmem:[%s6917_s3 + $0x140] sm:$0xff] }
 0x174   : > { %3766 = vmatprep.mubr.msk.f32.mxu0 %vm7187_vm11, %v5696_v59  ;;  %4279 = vmatpush3.bf16.msra.mxu0 %v4276_v45  ;;  %v7189_v48 = vld [vmem:[#allocation32_spill] sm:$0xff]  ;;  %vm7191_vm5 = vnez %v7190_v51  ;;  %v3170_v45 = vld [vmem:[%s6917_s3 + $0x2c0] sm:$0xff]  ;;  %vm7192_vm12 = vcmask 1046528   ;;  %v3171_v5 = vld [vmem:[%s6917_s3 + $0x2c8] sm:$0xff]  ;;  %vm7204_vm2 = vnez %v7071_v50  ;;  %vm7205_vm7 = vnez %v7079_v37 }
 0x175   : > { %3932 = vmatmul.mubr.f32.gmra.mrb[2].mxu1 %v7188_v58  ;;  %4281 = vmatprep.subr.bf16.mxu0 %v4280_v60  ;;  %v6319_v53 = vsel %vm7192_vm12, %v2314_v38, %v2315_v57  ;;  %vm7194_vm6 = vmmov %vm7192_vm12  ;;  %v6325_v27 = vsel %vm7164_vm0, %v2499_v26, %v2500_v12  ;;  %v6340_v15 = vsel %vm7199_vm14, %v2500_v12, %v2502_v61  ;;  %v7201_v11 = vld [vmem:[#allocation38_spill] sm:$0xff]  ;;  %v3172_v26 = vld [vmem:[%s6917_s3 + $0x2d0] sm:$0xff]  ;;  %vm7213_vm14 = vcmask 1046528  }
 0x176   : > { %4375 = vmatpush3.bf16.msra.mxu1 %v4372_v25  ;;  %3934 = vmatprep.mubr.f32.mxu1 %v5910_v63  ;;  %7193 = vst [vmem:[#allocation24_spill] sm:$0xff] %v6319_v53  ;;  %v6322_v58 = vsel %vm7194_vm6, %v2315_v57, %v2317_v34  ;;  %7196 = vst [vmem:[#allocation20_spill] sm:$0xff] %v6325_v27  ;;  %v3107_v34 = vld [vmem:[%s6917_s3 + $0x148] sm:$0xff]  ;;  %v3173_v61 = vld [vmem:[%s6917_s3 + $0x2d8] sm:$0xff]  ;;  %vm7206_vm12 = vnez %v7115_v0  ;;  %vm7215_vm4 = vnez %v7107_v35 }
 0x177   : > { %3767 = vmatmul.mubr.msk.f32.gmra.mrb[34].mxu0 %vm7191_vm5, %v7189_v48  ;;  %4377 = vmatprep.subr.bf16.mxu1 %v4376_v55  ;;  %7195 = vst [vmem:[#allocation22_spill] sm:$0xff] %v6322_v58  ;;  %7200 = vst [vmem:[#allocation28_spill] sm:$0xff] %v6340_v15  ;;  %v4288_v38 = vpack.c.bf16 %v3107_v34, %v3106_v47  ;;  %v3109_v12 = vld [vmem:[%s6917_s3 + $0x158] sm:$0xff]  ;;  %v3175_v47 = vld [vmem:[%s6917_s3 + $0x2e8] sm:$0xff] }
 0x178   : > { %3769 = vmatprep.mubr.msk.f32.mxu0 %vm5713_vm1, %v7197_v43  ;;  %4283 = vmatpush3.bf16.msra.mxu0 %v4280_v60  ;;  %v4384_v60 = vpack.c.bf16 %v3171_v5, %v3170_v45  ;;  %v3174_v5 = vld [vmem:[%s6917_s3 + $0x2e0] sm:$0xff]  ;;  %v3111_v34 = vld [vmem:[%s6917_s3 + $0x168] sm:$0xff]  ;;  %v3177_v15 = vld [vmem:[%s6917_s3 + $0x2f8] sm:$0xff] }
 0x179   : > { %3935 = vmatmul.mubr.f32.gmra.mrb[4].mxu1 %v5915_v16  ;;  %4285 = vmatprep.subr.bf16.mxu0 %v4284_v56  ;;  %v3226_v27 = vld [vmem:[%s6917_s3 + $0x400] sm:$0xff]  ;;  %v3227_v58 = vld [vmem:[%s6917_s3 + $0x408] sm:$0xff] }
 0x17a   : > { %4379 = vmatpush3.bf16.msra.mxu1 %v4376_v55  ;;  %3937 = vmatprep.mubr.f32.mxu1 %v5973_v54  ;;  %v3108_v55 = vld [vmem:[%s6917_s3 + $0x150] sm:$0xff]  ;;  %v7231_v35 = vld [vmem:[#allocation18_spill] sm:$0xff]  ;;  %v7250_v25 = vld [vmem:[#allocation23_spill] sm:$0xff] }
 0x17b   : > { %3770 = vmatmul.mubr.msk.f32.gmra.mrb[36].mxu0 %vm5671_vm13, %v7201_v11  ;;  %4381 = vmatprep.subr.bf16.mxu1 %v4380_v42  ;;  %v4292_v45 = vpack.c.bf16 %v3109_v12, %v3108_v55  ;;  %v3176_v12 = vld [vmem:[%s6917_s3 + $0x2f0] sm:$0xff] }
 0x17c   : > { %3772 = vmatprep.mubr.msk.f32.mxu0 %vm7203_vm15, %v5831_v30  ;;  %4287 = vmatpush3.bf16.msra.mxu0 %v4284_v56  ;;  %v4388_v56 = vpack.c.bf16 %v3173_v61, %v3172_v26  ;;  %v6394_v26 = vsel %vm6193_vm3, %v6207_v23, 0.0  ;;  %v4392_v61 = vpack.c.bf16 %v3175_v47, %v3174_v5  ;;  %v3113_v5 = vld [vmem:[%s6917_s3 + $0x178] sm:$0xff]  ;;  %v4396_v53 = vpack.c.bf16 %v3177_v15, %v3176_v12 }
 0x17d   : > { %3938 = vmatmul.mubr.f32.gmra.mrb[6].mxu1 %v5976_v1  ;;  %4289 = vmatprep.subr.bf16.mxu0 %v4288_v38  ;;  %v7207_v47 = vld [vmem:[#allocation45_spill] sm:$0xff]  ;;  %v6442_v12 = vpack.c.bf16 %v3227_v58, %v3226_v27  ;;  %v7217_v27 = vld [vmem:[#allocation44_spill] sm:$0xff] }
 0x17e   : > { %4383 = vmatpush3.bf16.msra.mxu1 %v4380_v42  ;;  %3940 = vmatprep.mubr.f32.mxu1 %v6065_v22  ;;  %v3110_v42 = vld [vmem:[%s6917_s3 + $0x160] sm:$0xff]  ;;  %v7211_v22 = vld [vmem:[#allocation49_spill] sm:$0xff]  ;;  %v3180_v58 = vld [vmem:[%s6917_s3 + $0x310] sm:$0xff] }
 0x17f   : > { %3773 = vmatmul.mubr.msk.f32.gmra.mrb[38].mxu0 %vm7204_vm2, %v5828_v33  ;;  %4385 = vmatprep.subr.bf16.mxu1 %v4384_v60  ;;  %v4296_v55 = vpack.c.bf16 %v3111_v34, %v3110_v42  ;;  %v7208_v42 = vld [vmem:[#allocation41_spill] sm:$0xff]  ;;  %vm7212_vm0 = vnez %v7211_v22  ;;  %v7234_v22 = vld [vmem:[#allocation40_spill] sm:$0xff] }
 0x180   : > { %3775 = vmatprep.mubr.msk.f32.mxu0 %vm5883_vm10, %v5888_v17  ;;  %4291 = vmatpush3.bf16.msra.mxu0 %v4288_v38  ;;  %v6389_v38 = vsel %vm6163_vm9, %v6219_v14, 0.0  ;;  %vm7209_vm6 = vnez %v7208_v42  ;;  %v7248_v51 = vld [vmem:[#allocation24_spill] sm:$0xff] }
 0x181   : > { %3941 = vmatmul.mubr.f32.gmra.mrb[8].mxu1 %v6071_v46  ;;  %4293 = vmatprep.subr.bf16.mxu0 %v4292_v45  ;;  %v1764_v34 = vrot.slane %v6389_v38, 1  ;;  %v7210_v46 = vld [vmem:[#allocation48_spill] sm:$0xff] }
 0x182   : > { %4387 = vmatpush3.bf16.msra.mxu1 %v4384_v60  ;;  %3943 = vmatprep.mubr.f32.mxu1 %v6110_v13  ;;  %v3112_v60 = vld [vmem:[%s6917_s3 + $0x170] sm:$0xff]  ;;  %v1766_v13 = vrot.slane %v6269_v44, 1 }
 0x183   : > { %3776 = vmatmul.mubr.msk.f32.gmra.mrb[40].mxu0 %vm7205_vm7, %v5970_v41  ;;  %4389 = vmatprep.subr.bf16.mxu1 %v4388_v56  ;;  %v7252_v57 = vld [vmem:[#allocation28_spill] sm:$0xff] }
 0x184   : > { %3778 = vmatprep.mubr.msk.f32.mxu0 %vm7206_vm12, %v6024_v24  ;;  %4295 = vmatpush3.bf16.msra.mxu0 %v4292_v45  ;;  %v1763_v45 = vrot.slane %v6394_v26, 1 }
 0x185   : > { %3944 = vmatmul.mubr.f32.gmra.mrb[10].mxu1 %v6143_v10  ;;  %4297 = vmatprep.subr.bf16.mxu0 %v4296_v55  ;;  %v4300_v10 = vpack.c.bf16 %v3113_v5, %v3112_v60  ;;  %v3229_v60 = vld [vmem:[%s6917_s3 + $0x418] sm:$0xff] }
 0x186   : > { %4391 = vmatpush3.bf16.msra.mxu1 %v4388_v56  ;;  %3946 = vmatprep.mubr.f32.mxu1 %v6175_v36  ;;  %v3178_v56 = vld [vmem:[%s6917_s3 + $0x300] sm:$0xff]  ;;  %v3179_v36 = vld [vmem:[%s6917_s3 + $0x308] sm:$0xff]  ;;  %v6437_v15 = vsel %vm7213_vm14, %v1763_v45, %v1764_v34  ;;  %v6452_v45 = vsel %vm7213_vm14, %v1764_v34, %v1766_v13  ;;  %vm7227_vm14 = vcmask 1045504  }
 0x187   : > { %3779 = vmatmul.mubr.msk.f32.gmra.mrb[42].mxu0 %vm7209_vm6, %v7207_v47  ;;  %4393 = vmatprep.subr.bf16.mxu1 %v4392_v61  ;;  %7214 = vst [vmem:[#allocation25_spill] sm:$0xff] %v6437_v15  ;;  %v4400_v5 = vpack.c.bf16 %v3179_v36, %v3178_v56  ;;  %7216 = vst [vmem:[#allocation30_spill] sm:$0xff] %v6452_v45  ;;  %v7218_v13 = vld [vmem:[#allocation46_spill] sm:$0xff]  ;;  %v3231_v36 = vld [vmem:[%s6917_s3 + $0x428] sm:$0xff] }
 0x188   : > { %3781 = vmatprep.mubr.msk.f32.mxu0 %vm7212_vm0, %v7210_v46  ;;  %4299 = vmatpush3.bf16.msra.mxu0 %v4296_v55  ;;  %v3228_v55 = vld [vmem:[%s6917_s3 + $0x410] sm:$0xff]  ;;  %v7219_v34 = vld [vmem:[#allocation47_spill] sm:$0xff]  ;;  %vm7228_vm8 = vmmov %vm7227_vm14 }
 0x189   : > { %3947 = vmatmul.mubr.f32.gmra.mrb[12].mxu1 %v6178_v31  ;;  %4301 = vmatprep.subr.bf16.mxu0 %v4300_v10 }
 0x18a   : > { %4395 = vmatpush3.bf16.msra.mxu1 %v4392_v61  ;;  %3949 = vmatprep.mubr.f32.mxu1 %v6437_v15  ;;  %v3181_v61 = vld [vmem:[%s6917_s3 + $0x318] sm:$0xff]  ;;  %v6463_v15 = vpack.c.bf16 %v3229_v60, %v3228_v55  ;;  %v3183_v55 = vld [vmem:[%s6917_s3 + $0x328] sm:$0xff]  ;;  %v7220_v60 = vld [vmem:[#allocation50_spill] sm:$0xff] }
 0x18b   : > { %3782 = vmatmul.mubr.msk.f32.gmra.mrb[44].mxu0 %vm7215_vm4, %v6137_v21  ;;  %4397 = vmatprep.subr.bf16.mxu1 %v4396_v53  ;;  %v4404_v56 = vpack.c.bf16 %v3181_v61, %v3180_v58  ;;  %v3232_v58 = vld [vmem:[%s6917_s3 + $0x430] sm:$0xff]  ;;  %v3233_v61 = vld [vmem:[%s6917_s3 + $0x438] sm:$0xff] }
 0x18c   : > { %4303 = vmatpush3.bf16.msra.mxu0 %v4300_v10  ;;  %3816 = vmatprep.mubr.f32.mxu0 %v7217_v27  ;;  %v3230_v10 = vld [vmem:[%s6917_s3 + $0x420] sm:$0xff] }
 0x18d   : > { %3950 = vmatmul.mubr.f32.gmra.mrb[14].mxu1 %v6452_v45  ;;  %4465 = vmatprep.subr.bf16.mxu0 %v6442_v12  ;;  %v6483_v27 = vpack.c.bf16 %v3231_v36, %v3230_v10  ;;  %v3185_v10 = vld [vmem:[%s6917_s3 + $0x338] sm:$0xff]  ;;  %v7222_v36 = vld [vmem:[#allocation26_spill] sm:$0xff] }
 0x18e   : > { %4399 = vmatpush3.bf16.msra.mxu1 %v4396_v53  ;;  %3984 = vmatprep.mubr.f32.mxu1 %v7218_v13  ;;  %v3182_v53 = vld [vmem:[%s6917_s3 + $0x320] sm:$0xff] }
 0x18f   : > { %4401 = vmatprep.subr.bf16.mxu1 %v4400_v5  ;;  %3817 = vmatmul.mubr.f32.vlgmr.msra.gmra.mrb[30].mxu0 %v7219_v34  ;;  %7221 = vst [vmem:[#allocation21_spill] sm:$0xff] %v6483_v27  ;;  %v6503_v34 = vpack.c.bf16 %v3233_v61, %v3232_v58  ;;  %v3187_v58 = vld [vmem:[%s6917_s3 + $0x348] sm:$0xff] }
 0x190   : > { %3819 = vmatprep.mubr.f32.mxu0 %v7218_v13  ;;  %4467 = vmatpush3.bf16.msra.mxu0 %v6442_v12  ;;  %v4408_v13 = vpack.c.bf16 %v3183_v55, %v3182_v53  ;;  %v3234_v53 = vld [vmem:[%s6917_s3 + $0x440] sm:$0xff]  ;;  %v3235_v55 = vld [vmem:[%s6917_s3 + $0x448] sm:$0xff] }
 0x191   : > { %3985 = vmatmul.mubr.f32.vlgmr.msra.gmra.mrb[0].mxu1 %v7220_v60  ;;  %4469 = vmatprep.subr.bf16.mxu0 %v6463_v15  ;;  %7223 = vst [vmem:[#allocation19_spill] sm:$0xff] %v6503_v34  ;;  %v6523_v61 = vpack.c.bf16 %v3235_v55, %v3234_v53  ;;  %v3189_v53 = vld [vmem:[%s6917_s3 + $0x358] sm:$0xff] }
 0x192   : > { %4403 = vmatpush3.bf16.msra.mxu1 %v4400_v5  ;;  %3987 = vmatprep.mubr.f32.mxu1 %v6124_v19  ;;  %v3184_v5 = vld [vmem:[%s6917_s3 + $0x330] sm:$0xff] }
 0x193   : > { %4405 = vmatprep.subr.bf16.mxu1 %v4404_v56  ;;  %3820 = vmatmul.mubr.f32.gmra.mrb[32].mxu0 %v7220_v60  ;;  %v4412_v60 = vpack.c.bf16 %v3185_v10, %v3184_v5  ;;  %7224 = vst [vmem:[#allocation32_spill] sm:$0xff] %v6523_v61  ;;  %v3236_v5 = vld [vmem:[%s6917_s3 + $0x450] sm:$0xff]  ;;  %v3237_v10 = vld [vmem:[%s6917_s3 + $0x458] sm:$0xff] }
 0x194   : > { %3822 = vmatprep.mubr.f32.mxu0 %v6124_v19  ;;  %4471 = vmatpush3.bf16.msra.mxu0 %v6463_v15  ;;  %v6543_v55 = vpack.c.bf16 %v3237_v10, %v3236_v5  ;;  %v3191_v5 = vld [vmem:[%s6917_s3 + $0x368] sm:$0xff]  ;;  %v1384_v10 = vrot.slane %v6151_v20, 2 }
 0x195   : > { %3988 = vmatmul.mubr.f32.gmra.mrb[2].mxu1 %v7222_v36  ;;  %4473 = vmatprep.subr.bf16.mxu0 %v6483_v27  ;;  %v7226_v20 = vld [vmem:[#allocation27_spill] sm:$0xff] }
 0x196   : > { %4407 = vmatpush3.bf16.msra.mxu1 %v4404_v56  ;;  %3990 = vmatprep.mubr.f32.mxu1 %v6168_v28  ;;  %v3186_v56 = vld [vmem:[%s6917_s3 + $0x340] sm:$0xff] }
 0x197   : > { %4409 = vmatprep.subr.bf16.mxu1 %v4408_v13  ;;  %3823 = vmatmul.mubr.f32.gmra.mrb[34].mxu0 %v7222_v36  ;;  %v4416_v45 = vpack.c.bf16 %v3187_v58, %v3186_v56  ;;  %v3238_v56 = vld [vmem:[%s6917_s3 + $0x460] sm:$0xff]  ;;  %v3239_v58 = vld [vmem:[%s6917_s3 + $0x468] sm:$0xff] }
 0x198   : > { %3825 = vmatprep.mubr.f32.mxu0 %v6168_v28  ;;  %4475 = vmatpush3.bf16.msra.mxu0 %v6483_v27  ;;  %v7239_v7 = vld [vmem:[#allocation19_spill] sm:$0xff] }
 0x199   : > { %3991 = vmatmul.mubr.f32.gmra.mrb[4].mxu1 %v6171_v32  ;;  %4477 = vmatprep.subr.bf16.mxu0 %v6503_v34 }
 0x19a   : > { %4411 = vmatpush3.bf16.msra.mxu1 %v4408_v13  ;;  %3993 = vmatprep.mubr.f32.mxu1 %v6182_v9  ;;  %v3188_v13 = vld [vmem:[%s6917_s3 + $0x350] sm:$0xff] }
 0x19b   : > { %4413 = vmatprep.subr.bf16.mxu1 %v4412_v60  ;;  %3826 = vmatmul.mubr.f32.gmra.mrb[36].mxu0 %v6171_v32  ;;  %v4420_v31 = vpack.c.bf16 %v3189_v53, %v3188_v13  ;;  %v3240_v13 = vld [vmem:[%s6917_s3 + $0x470] sm:$0xff]  ;;  %v3241_v53 = vld [vmem:[%s6917_s3 + $0x478] sm:$0xff] }
 0x19c   : > { %3828 = vmatprep.mubr.f32.mxu0 %v6182_v9  ;;  %4479 = vmatpush3.bf16.msra.mxu0 %v6503_v34  ;;  %v6564_v34 = vpack.c.bf16 %v3239_v58, %v3238_v56  ;;  %v1386_v56 = vrot.slane %v7226_v20, 2  ;;  %v3193_v58 = vld [vmem:[%s6917_s3 + $0x378] sm:$0xff] }
 0x19d   : > { %3994 = vmatmul.mubr.f32.gmra.mrb[6].mxu1 %v6185_v2  ;;  %4481 = vmatprep.subr.bf16.mxu0 %v6523_v61 }
 0x19e   : > { %4415 = vmatpush3.bf16.msra.mxu1 %v4412_v60  ;;  %3996 = vmatprep.mubr.f32.mxu1 %v6213_v39  ;;  %v3190_v60 = vld [vmem:[%s6917_s3 + $0x360] sm:$0xff] }
 0x19f   : > { %4417 = vmatprep.subr.bf16.mxu1 %v4416_v45  ;;  %3829 = vmatmul.mubr.f32.gmra.mrb[38].mxu0 %v6185_v2  ;;  %v4424_v27 = vpack.c.bf16 %v3191_v5, %v3190_v60  ;;  %v1949_v60 = vrot.slane %v6389_v38, 2  ;;  %v6591_v5 = vpack.c.bf16 %v3241_v53, %v3240_v13  ;;  %v3210_v38 = vld [vmem:[%s6917_s3 + $0x380] sm:$0xff]  ;;  %v3212_v13 = vld [vmem:[%s6917_s3 + $0x390] sm:$0xff]  ;;  %v3215_v53 = vld [vmem:[%s6917_s3 + $0x3a8] sm:$0xff] }
 0x1a0   : > { %3831 = vmatprep.mubr.f32.mxu0 %v6213_v39  ;;  %4483 = vmatpush3.bf16.msra.mxu0 %v6523_v61  ;;  %v7225_v61 = vld [vmem:[#allocation53_spill] sm:$0xff] }
 0x1a1   : > { %3997 = vmatmul.mubr.f32.gmra.mrb[8].mxu1 %v6216_v6  ;;  %4485 = vmatprep.subr.bf16.mxu0 %v6543_v55  ;;  %v1383_v1 = vrot.slane %v7225_v61, 2  ;;  %v1948_v61 = vrot.slane %v6394_v26, 2 }
 0x1a2   : > { %4419 = vmatpush3.bf16.msra.mxu1 %v4416_v45  ;;  %3999 = vmatprep.mubr.f32.mxu1 %v6225_v40  ;;  %v3192_v45 = vld [vmem:[%s6917_s3 + $0x370] sm:$0xff] }
 0x1a3   : > { %4421 = vmatprep.subr.bf16.mxu1 %v4420_v31  ;;  %3832 = vmatmul.mubr.f32.gmra.mrb[40].mxu0 %v6216_v6  ;;  %v6586_v54 = vsel %vm7227_vm14, %v1383_v1, %v1384_v10  ;;  %v4428_v20 = vpack.c.bf16 %v3193_v58, %v3192_v45  ;;  %v6597_v1 = vsel %vm7228_vm8, %v1384_v10, %v1386_v56  ;;  %vm7229_vm14 = vmmov %vm7228_vm8 }
 0x1a4   : > { %3834 = vmatprep.mubr.f32.mxu0 %v6225_v40  ;;  %4487 = vmatpush3.bf16.msra.mxu0 %v6543_v55  ;;  %v1951_v40 = vrot.slane %v6269_v44, 2  ;;  %v6609_v26 = vsel %vm7229_vm14, %v1948_v61, %v1949_v60 }
 0x1a5   : > { %4000 = vmatmul.mubr.f32.gmra.mrb[10].mxu1 %v6228_v4  ;;  %4489 = vmatprep.subr.bf16.mxu0 %v6564_v34 }
 0x1a6   : > { %4423 = vmatpush3.bf16.msra.mxu1 %v4420_v31  ;;  %4002 = vmatprep.mubr.f32.mxu1 %v6586_v54  ;;  %v3211_v31 = vld [vmem:[%s6917_s3 + $0x388] sm:$0xff]  ;;  %v6615_v10 = vsel %vm7228_vm8, %v1949_v60, %v1951_v40 }
 0x1a7   : > { %4425 = vmatprep.subr.bf16.mxu1 %v4424_v27  ;;  %3835 = vmatmul.mubr.f32.gmra.mrb[42].mxu0 %v6228_v4  ;;  %v4432_v44 = vpack.c.bf16 %v3211_v31, %v3210_v38 }
 0x1a8   : > { %3837 = vmatprep.mubr.f32.mxu0 %v6586_v54  ;;  %4491 = vmatpush3.bf16.msra.mxu0 %v6564_v34 }
 0x1a9   : > { %4003 = vmatmul.mubr.f32.gmra.mrb[12].mxu1 %v6597_v1  ;;  %4493 = vmatprep.subr.bf16.mxu0 %v6591_v5 }
 0x1aa   : > { %4427 = vmatpush3.bf16.msra.mxu1 %v4424_v27  ;;  %4005 = vmatprep.mubr.f32.mxu1 %v6609_v26  ;;  %v3213_v27 = vld [vmem:[%s6917_s3 + $0x398] sm:$0xff] }
 0x1ab   : > { %4429 = vmatprep.subr.bf16.mxu1 %v4428_v20  ;;  %3838 = vmatmul.mubr.f32.gmra.mrb[44].mxu0 %v6597_v1  ;;  %v4436_v40 = vpack.c.bf16 %v3213_v27, %v3212_v13 }
 0x1ac   : > { %4495 = vmatpush3.bf16.msra.mxu0 %v6591_v5  ;;  %4152 = vmatprep.mubr.f32.mxu0 %v6124_v19  ;;  %v3214_v19 = vld [vmem:[%s6917_s3 + $0x3a0] sm:$0xff] }
 0x1ad   : > { %4006 = vmatmul.mubr.f32.gmra.mrb[14].mxu1 %v6615_v10  ;;  %v4440_v3 = vpack.c.bf16 %v3215_v53, %v3214_v19 }
 0x1ae   : > { %4431 = vmatpush3.bf16.msra.mxu1 %v4428_v20  ;;  %4040 = vmatprep.mubr.msk.f32.mxu1 %vm7187_vm11, %v5696_v59  ;;  %v3216_v59 = vld [vmem:[%s6917_s3 + $0x3b0] sm:$0xff] }
 0x1af   : > { %4433 = vmatprep.subr.bf16.mxu1 %v4432_v44  ;;  %4153 = vmatmul.mubr.f32.vlgmr.msra.gmra.mrb[46].mxu0 %v7222_v36 }
 0x1b0   : > { %4155 = vmatprep.mubr.f32.mxu0 %v6168_v28  ;;  %v3217_v28 = vld [vmem:[%s6917_s3 + $0x3b8] sm:$0xff] }
 0x1b1   : > { %4041 = vmatmul.mubr.msk.f32.vlgmr.msra.gmra.mrb[0].mxu1 %vm7191_vm5, %v7189_v48  ;;  %v3219_v48 = vld [vmem:[%s6917_s3 + $0x3c8] sm:$0xff] }
 0x1b2   : > { %4435 = vmatpush3.bf16.msra.mxu1 %v4432_v44  ;;  %4043 = vmatprep.mubr.msk.f32.mxu1 %vm5713_vm1, %v7197_v43  ;;  %v7249_v43 = vld [vmem:[#allocation22_spill] sm:$0xff] }
 0x1b3   : > { %4437 = vmatprep.subr.bf16.mxu1 %v4436_v40  ;;  %4156 = vmatmul.mubr.f32.gmra.mrb[48].mxu0 %v6171_v32  ;;  %v4444_v32 = vpack.c.bf16 %v3217_v28, %v3216_v59 }
 0x1b4   : > { %4158 = vmatprep.mubr.f32.mxu0 %v6182_v9  ;;  %v3218_v9 = vld [vmem:[%s6917_s3 + $0x3c0] sm:$0xff] }
 0x1b5   : > { %4044 = vmatmul.mubr.msk.f32.gmra.mrb[2].mxu1 %vm5671_vm13, %v7201_v11  ;;  %v4448_v49 = vpack.c.bf16 %v3219_v48, %v3218_v9  ;;  %vm7230_vm13 = vnez %v7178_v62  ;;  %v7246_v62 = vld [vmem:[#allocation25_spill] sm:$0xff]  ;;  %v7251_v11 = vld [vmem:[#allocation20_spill] sm:$0xff] }
 0x1b6   : > { %4439 = vmatpush3.bf16.msra.mxu1 %v4436_v40  ;;  %4046 = vmatprep.mubr.msk.f32.mxu1 %vm7203_vm15, %v5831_v30  ;;  %v3220_v30 = vld [vmem:[%s6917_s3 + $0x3d0] sm:$0xff] }
 0x1b7   : > { %4441 = vmatprep.subr.bf16.mxu1 %v4440_v3  ;;  %4159 = vmatmul.mubr.f32.gmra.mrb[50].mxu0 %v6185_v2  ;;  %v3221_v2 = vld [vmem:[%s6917_s3 + $0x3d8] sm:$0xff] }
 0x1b8   : > { %4161 = vmatprep.mubr.f32.mxu0 %v6213_v39  ;;  %v4452_v50 = vpack.c.bf16 %v3221_v2, %v3220_v30  ;;  %v7244_v39 = vld [vmem:[#allocation29_spill] sm:$0xff] }
 0x1b9   : > { %4047 = vmatmul.mubr.msk.f32.gmra.mrb[4].mxu1 %vm7204_vm2, %v5828_v33  ;;  %v3222_v33 = vld [vmem:[%s6917_s3 + $0x3e0] sm:$0xff] }
 0x1ba   : > { %4443 = vmatpush3.bf16.msra.mxu1 %v4440_v3  ;;  %4049 = vmatprep.mubr.msk.f32.mxu1 %vm5883_vm10, %v5888_v17  ;;  %v4456_v37 = vpack.c.bf16 %v3223_v29, %v3222_v33  ;;  %v3224_v17 = vld [vmem:[%s6917_s3 + $0x3f0] sm:$0xff]  ;;  %v6776_v3 = vld [vmem:[%s6918_s4] ss:$0 sm:$0xff] }
 0x1bb   : > { %4445 = vmatprep.subr.bf16.mxu1 %v4444_v32  ;;  %4162 = vmatmul.mubr.f32.gmra.mrb[52].mxu0 %v6216_v6  ;;  %v7237_v6 = vld [vmem:[#allocation43_spill] sm:$0xff] }
 0x1bd   : > { %4050 = vmatmul.mubr.msk.f32.gmra.mrb[6].mxu1 %vm7205_vm7, %v5970_v41  ;;  %v3225_v41 = vld [vmem:[%s6917_s3 + $0x3f8] sm:$0xff] }
 0x1be   : > { %4447 = vmatpush3.bf16.msra.mxu1 %v4444_v32  ;;  %4052 = vmatprep.mubr.msk.f32.mxu1 %vm7206_vm12, %v6024_v24  ;;  %v4460_v0 = vpack.c.bf16 %v3225_v41, %v3224_v17  ;;  %v7233_v24 = vld [vmem:[#allocation39_spill] sm:$0xff] }
 0x1bf   : > { %4449 = vmatprep.subr.bf16.mxu1 %v4448_v49 }
 0x1c1   : > { %4053 = vmatmul.mubr.msk.f32.gmra.mrb[8].mxu1 %vm7209_vm6, %v7207_v47 }
 0x1c2   : > { %4451 = vmatpush3.bf16.msra.mxu1 %v4448_v49  ;;  %4055 = vmatprep.mubr.msk.f32.mxu1 %vm7212_vm0, %v7210_v46  ;;  %v7236_v46 = vld [vmem:[#allocation21_spill] sm:$0xff] }
 0x1c3   : > { %4453 = vmatprep.subr.bf16.mxu1 %v4452_v50 }
 0x1c5   : > { %4056 = vmatmul.mubr.msk.f32.gmra.mrb[10].mxu1 %vm7215_vm4, %v6137_v21  ;;  %vm7232_vm4 = vnez %v7231_v35  ;;  %v7238_v21 = vld [vmem:[#allocation51_spill] sm:$0xff] }
 0x1c6   : > { %4455 = vmatpush3.bf16.msra.mxu1 %v4452_v50  ;;  %4058 = vmatprep.mubr.msk.f32.mxu1 %vm6193_vm3, %v6207_v23  ;;  %v7243_v23 = vld [vmem:[#allocation37_spill] sm:$0xff] }
 0x1c7   : > { %4457 = vmatprep.subr.bf16.mxu1 %v4456_v37 }
 0x1c9   : > { %4059 = vmatmul.mubr.msk.f32.gmra.mrb[12].mxu1 %vm6163_vm9, %v6219_v14  ;;  %v7235_v14 = vld [vmem:[#allocation42_spill] sm:$0xff] }
 0x1ca   : > { %4459 = vmatpush3.bf16.msra.mxu1 %v4456_v37  ;;  %4061 = vmatprep.mubr.msk.f32.mxu1 %vm7230_vm13, %v6222_v8  ;;  %v7245_v8 = vld [vmem:[#allocation54_spill] sm:$0xff] }
 0x1cb   : > { %4461 = vmatprep.subr.bf16.mxu1 %v4460_v0 }
 0x1cd   : > { %4062 = vmatmul.mubr.msk.f32.gmra.mrb[14].mxu1 %vm7232_vm4, %v6288_v18  ;;  %v7247_v18 = vld [vmem:[#allocation30_spill] sm:$0xff] }
 0x1ce   : > { %4463 = vmatpush3.bf16.msra.mxu1 %v4460_v0  ;;  %4096 = vmatprep.mubr.f32.mxu1 %v7233_v24 }
 0x1cf   : > { %4496 = vmatprep.subr.bf16.mxu1 %v6442_v12 }
 0x1d1   : > { %4097 = vmatmul.mubr.f32.vlgmr.msra.gmra.mrb[0].mxu1 %v7234_v22 }
 0x1d2   : > { %4504 = vmatpush3.bf16.msra.mxu1 %v6442_v12  ;;  %4099 = vmatprep.mubr.f32.mxu1 %v5910_v63  ;;  %v7241_v63 = vld [vmem:[#allocation35_spill] sm:$0xff] }
 0x1d3   : > { %4497 = vmatprep.subr.bf16.mxu1 %v6463_v15 }
 0x1d5   : > { %4100 = vmatmul.mubr.f32.gmra.mrb[2].mxu1 %v5915_v16  ;;  %v7242_v16 = vld [vmem:[#allocation32_spill] sm:$0xff] }
 0x1d6   : > { %4505 = vmatpush3.bf16.msra.mxu1 %v6463_v15  ;;  %4102 = vmatprep.mubr.f32.mxu1 %v7235_v14 }
 0x1d7   : > { %4498 = vmatprep.subr.bf16.mxu1 %v7236_v46 }
 0x1d9   : > { %4103 = vmatmul.mubr.f32.gmra.mrb[4].mxu1 %v7237_v6 }
 0x1da   : > { %4506 = vmatpush3.bf16.msra.mxu1 %v7236_v46  ;;  %4105 = vmatprep.mubr.f32.mxu1 %v7238_v21 }
 0x1db   : > { %4499 = vmatprep.subr.bf16.mxu1 %v7239_v7 }
 0x1dd   : > { %4106 = vmatmul.mubr.f32.gmra.mrb[6].mxu1 %v7240_v52 }
 0x1de   : > { %4507 = vmatpush3.bf16.msra.mxu1 %v7239_v7  ;;  %4108 = vmatprep.mubr.f32.mxu1 %v7241_v63 }
 0x1df   : > { %4500 = vmatprep.subr.bf16.mxu1 %v7242_v16 }
 0x1e1   : > { %4109 = vmatmul.mubr.f32.gmra.mrb[8].mxu1 %v7243_v23 }
 0x1e2   : > { %4508 = vmatpush3.bf16.msra.mxu1 %v7242_v16  ;;  %4111 = vmatprep.mubr.f32.mxu1 %v7244_v39 }
 0x1e3   : > { %4501 = vmatprep.subr.bf16.mxu1 %v6543_v55 }
 0x1e5   : > { %4112 = vmatmul.mubr.f32.gmra.mrb[10].mxu1 %v7245_v8 }
 0x1e6   : > { %4509 = vmatpush3.bf16.msra.mxu1 %v6543_v55  ;;  %4114 = vmatprep.mubr.f32.mxu1 %v7246_v62 }
 0x1e7   : > { %4502 = vmatprep.subr.bf16.mxu1 %v6564_v34 }
 0x1e9   : > { %4115 = vmatmul.mubr.f32.gmra.mrb[12].mxu1 %v7247_v18 }
 0x1ea   : > { %4510 = vmatpush3.bf16.msra.mxu1 %v6564_v34  ;;  %4117 = vmatprep.mubr.f32.mxu1 %v7248_v51 }
 0x1eb   : > { %4503 = vmatprep.subr.bf16.mxu1 %v6591_v5 }
 0x1ed   : > { %4118 = vmatmul.mubr.f32.gmra.mrb[14].mxu1 %v7249_v43 }
 0x1ee   : > { %4511 = vmatpush3.bf16.msra.mxu1 %v6591_v5  ;;  %4164 = vmatprep.mubr.f32.mxu1 %v7250_v25 }
 0x1f1   : > { %4165 = vmatmul.mubr.f32.vlgmr.msra.gmra.mrb[8].mxu1 %v6228_v4 }
 0x1f2   : > { %4167 = vmatprep.mubr.f32.mxu1 %v6586_v54 }
 0x1f5   : > { %4168 = vmatmul.mubr.f32.gmra.mrb[10].mxu1 %v6597_v1 }
 0x1f6   : > { %4170 = vmatprep.mubr.f32.mxu1 %v6609_v26 }
 0x1f9   : > { %4171 = vmatmul.mubr.f32.gmra.mrb[12].mxu1 %v6615_v10 }
 0x1fa   : > { %4173 = vmatprep.mubr.f32.mxu1 %v7251_v11 }
 0x1fd   : > { %4174 = vmatmul.mubr.f32.gmra.mrb[14].mxu1 %v7252_v57 }
 0x262   : > { %v3818_v47 = vpop.f32.mrb[30].mxu0 }
 0x263   : > { %v1487_v42 = vpop.f32.mrb[31].mxu0 }
 0x266   : > { %v3821_v15 = vpop.f32.mrb[32].mxu0 }
 0x267   : > { %v1497_v12 = vpop.f32.mrb[33].mxu0 }
 0x26a   : > { %v3824_v36 = vpop.f32.mrb[34].mxu0 }
 0x26b   : > { %v1507_v34 = vpop.f32.mrb[35].mxu0 }
 0x26e   : > { %v3827_v55 = vpop.f32.mrb[36].mxu0 }
 0x26f   : > { %v1517_v4 = vpop.f32.mrb[37].mxu0 }
 0x272   : > { %v6757_v56 = vpop.f32.mrb[38].mxu0 }
 0x273   : > { %v6759_v54 = vpop.f32.mrb[39].mxu0 }
 0x276   : > { %v6761_v45 = vpop.f32.mrb[40].mxu0 }
 0x277   : > { %v6763_v58 = vpop.f32.mrb[41].mxu0 }
 0x27a   : > { %v6765_v61 = vpop.f32.mrb[42].mxu0 }
 0x27b   : > { %v6767_v60 = vpop.f32.mrb[43].mxu0 }
 0x27e   : > { %v6769_v5 = vpop.f32.mrb[44].mxu0 }
 0x27f   : > { %v6771_v20 = vpop.f32.mrb[45].mxu0 }
 0x282   : > { %v4154_v1 = vpop.f32.mrb[46].mxu0 }
 0x283   : > { %v2589_v38 = vpop.f32.mrb[47].mxu0 }
 0x286   : > { %v4157_v31 = vpop.f32.mrb[48].mxu0 }
 0x287   : > { %v2599_v26 = vpop.f32.mrb[49].mxu0 }
 0x28a   : > { %v4160_v44 = vpop.f32.mrb[50].mxu0 }
 0x28b   : > { %v2609_v10 = vpop.f32.mrb[51].mxu0 }
 0x28e   : > { %v4163_v13 = vpop.f32.mrb[52].mxu0 }
 0x28f   : > { %v2619_v27 = vpop.f32.mrb[53].mxu0 }
 0x2a4   : > { %v4098_v40 = vpop.f32.mrb[0].mxu1 }
 0x2a5   : > { %v4512_v19 = vadd.f32 %v4098_v40, %v3818_v47  ;;  %v2404_v53 = vpop.f32.mrb[1].mxu1 }
 0x2a6   : > { %v4514_v59 = vadd.f32 %v2404_v53, %v1487_v42 }
 0x2a7   : > { %v4513_v28 = vadd.f32 %v4512_v19, %v4154_v1 }
 0x2a8   : > { %v4515_v32 = vadd.f32 %v4514_v59, %v2589_v38  ;;  %v4101_v9 = vpop.f32.mrb[2].mxu1 }
 0x2a9   : > { %v6779_v48 = vadd.f32 %v4513_v28, %v6776_v3  ;;  %v4516_v49 = vadd.f32 %v4101_v9, %v3821_v15  ;;  %v2414_v30 = vpop.f32.mrb[3].mxu1 }
 0x2aa   : > { %v6782_v2 = vadd.f32 %v4515_v32, %v6776_v3  ;;  %v4518_v50 = vadd.f32 %v2414_v30, %v1497_v12  ;;  %v7253_v30 = vld [vmem:[#allocation3_spill] sm:$0xff] }
 0x2ab   : > { %v3244_v33 = vmul.f32 -1.442695, %v6779_v48  ;;  %v4517_v29 = vadd.f32 %v4516_v49, %v4157_v31 }
 0x2ac   : > { %v3243_v37 = vmul.f32 -1.442695, %v6782_v2  ;;  %v4519_v17 = vadd.f32 %v4518_v50, %v2599_v26  ;;  %v4104_v41 = vpop.f32.mrb[4].mxu1 }
 0x2ad   : > { %4801 = vpow2.f32 %v3244_v33  ;;  %v6787_v0 = vadd.f32 %v4517_v29, %v6776_v3  ;;  %v4520_v35 = vadd.f32 %v4104_v41, %v3824_v36  ;;  %v2424_v24 = vpop.f32.mrb[5].mxu1  ;;  %v7254_v29 = vld [vmem:[#allocation2_spill] sm:$0xff] }
 0x2ae   : > { %4803 = vpow2.f32 %v3243_v37  ;;  %v6790_v22 = vadd.f32 %v4519_v17, %v6776_v3  ;;  %v4522_v14 = vadd.f32 %v2424_v24, %v1507_v34 }
 0x2af   : > { %v3246_v46 = vmul.f32 -1.442695, %v6787_v0  ;;  %v4521_v6 = vadd.f32 %v4520_v35, %v4160_v44 }
 0x2b0   : > { %v3245_v21 = vmul.f32 -1.442695, %v6790_v22  ;;  %v4523_v7 = vadd.f32 %v4522_v14, %v2609_v10  ;;  %v4107_v52 = vpop.f32.mrb[6].mxu1 }
 0x2b1   : > { %4805 = vpow2.f32 %v3246_v46  ;;  %v6795_v63 = vadd.f32 %v4521_v6, %v6776_v3  ;;  %v4524_v16 = vadd.f32 %v4107_v52, %v3827_v55  ;;  %v2434_v23 = vpop.f32.mrb[7].mxu1 }
 0x2b2   : > { %4807 = vpow2.f32 %v3245_v21  ;;  %v6798_v39 = vadd.f32 %v4523_v7, %v6776_v3  ;;  %v4526_v8 = vadd.f32 %v2434_v23, %v1517_v4  ;;  %v7255_v7 = vld [vmem:[#allocation5_spill] sm:$0xff]  ;;  %v7256_v23 = vld [vmem:[#allocation4_spill] sm:$0xff] }
 0x2b3   : > { %v3248_v62 = vmul.f32 -1.442695, %v6795_v63  ;;  %v4525_v18 = vadd.f32 %v4524_v16, %v4163_v13 }
 0x2b4   : > { %v3247_v51 = vmul.f32 -1.442695, %v6798_v39  ;;  %v4527_v43 = vadd.f32 %v4526_v8, %v2619_v27 }
 0x2b5   : > { %4809 = vpow2.f32 %v3248_v62  ;;  %v6805_v25 = vadd.f32 %v4525_v18, %v6776_v3 }
 0x2b6   : > { %4811 = vpow2.f32 %v3247_v51  ;;  %v6808_v11 = vadd.f32 %v4527_v43, %v6776_v3 }
 0x2b7   : > { %v4802_v57 = vpop.eup %4801  ;;  %v3250_v47 = vmul.f32 -1.442695, %v6805_v25 }
 0x2b8   : > { %v4804_v42 = vpop.eup %4803  ;;  %v2756_v15 = vadd.f32 1.0, %v4802_v57  ;;  %v3249_v12 = vmul.f32 -1.442695, %v6808_v11 }
 0x2b9   : > { %v2755_v36 = vadd.f32 1.0, %v4804_v42  ;;  %4813 = vpow2.f32 %v3250_v47 }
 0x2ba   : > { %4815 = vrcp.f32 %v2756_v15  ;;  %v7257_v15 = vld [vmem:[#allocation7_spill] sm:$0xff] }
 0x2bb   : > { %v4806_v34 = vpop.eup %4805  ;;  %4817 = vrcp.f32 %v2755_v36 }
 0x2bc   : > { %v4808_v55 = vpop.eup %4807  ;;  %v2758_v4 = vadd.f32 1.0, %v4806_v34  ;;  %4819 = vpow2.f32 %v3249_v12  ;;  %v7258_v34 = vld [vmem:[#allocation6_spill] sm:$0xff] }
 0x2bd   : > { %v2757_v1 = vadd.f32 1.0, %v4808_v55 }
 0x2be   : > { %4821 = vrcp.f32 %v2758_v4 }
 0x2bf   : > { %v4810_v38 = vpop.eup %4809  ;;  %4823 = vrcp.f32 %v2757_v1 }
 0x2c0   : > { %v4812_v31 = vpop.eup %4811  ;;  %v2760_v26 = vadd.f32 1.0, %v4810_v38 }
 0x2c1   : > { %v2759_v44 = vadd.f32 1.0, %v4812_v31 }
 0x2c2   : > { %4825 = vrcp.f32 %v2760_v26 }
 0x2c3   : > { %v4814_v10 = vpop.eup %4813  ;;  %4827 = vrcp.f32 %v2759_v44 }
 0x2c4   : > { %v4816_v13 = vpop.eup %4815  ;;  %v2762_v27 = vadd.f32 1.0, %v4814_v10  ;;  %v4166_v40 = vpop.f32.mrb[8].mxu1  ;;  %v7259_v10 = vld [vmem:[#allocation9_spill] sm:$0xff] }
 0x2c5   : > { %v4818_v19 = vpop.eup %4817  ;;  %v2804_v53 = vmul.f32 %v4816_v13, %v6779_v48  ;;  %v4528_v59 = vadd.f32 %v4166_v40, %v6757_v56  ;;  %v2629_v28 = vpop.f32.mrb[9].mxu1 }
 0x2c6   : > { %v4820_v32 = vpop.eup %4819  ;;  %v2803_v9 = vmul.f32 %v4818_v19, %v6782_v2  ;;  %4829 = vrcp.f32 %v2762_v27  ;;  %v4529_v49 = vadd.f32 %v2629_v28, %v6759_v54 }
 0x2c7   : > { %v2900_v50 = vadd.f32 %v7253_v30, %v2804_v53  ;;  %v2761_v33 = vadd.f32 1.0, %v4820_v32  ;;  %v6825_v48 = vadd.f32 %v4528_v59, %v6776_v3  ;;  %v7260_v59 = vld [vmem:[#allocation8_spill] sm:$0xff] }
 0x2c8   : > { %v4822_v56 = vpop.eup %4821  ;;  %v2899_v37 = vadd.f32 %v7254_v29, %v2803_v9  ;;  %v6829_v17 = vadd.f32 %v4529_v49, %v6776_v3  ;;  %v4169_v41 = vpop.f32.mrb[10].mxu1 }
 0x2c9   : > { %v4824_v35 = vpop.eup %4823  ;;  %2916 = vst [vmem:[%s6819_s7 + $0x8] sm:$0xff] %v2900_v50  ;;  %v2806_v2 = vmul.f32 %v4822_v56, %v6787_v0  ;;  %4831 = vrcp.f32 %v2761_v33  ;;  %v3252_v54 = vmul.f32 -1.442695, %v6825_v48  ;;  %v4530_v24 = vadd.f32 %v4169_v41, %v6761_v45  ;;  %v2639_v14 = vpop.f32.mrb[11].mxu1 }
 0x2ca   : > { %2915 = vst [vmem:[%s6819_s7] sm:$0xff] %v2899_v37  ;;  %v2805_v46 = vmul.f32 %v4824_v35, %v6790_v22  ;;  %v3251_v6 = vmul.f32 -1.442695, %v6829_v17  ;;  %v4531_v21 = vadd.f32 %v2639_v14, %v6763_v58 }
 0x2cb   : > { %v2902_v52 = vadd.f32 %v7255_v7, %v2806_v2  ;;  %4833 = vpow2.f32 %v3252_v54  ;;  %v6841_v0 = vadd.f32 %v4530_v24, %v6776_v3 }
 0x2cc   : > { %v4826_v16 = vpop.eup %4825  ;;  %v2901_v8 = vadd.f32 %v7256_v23, %v2805_v46  ;;  %4835 = vpow2.f32 %v3251_v6  ;;  %v6845_v45 = vadd.f32 %v4531_v21, %v6776_v3  ;;  %v4172_v62 = vpop.f32.mrb[12].mxu1  ;;  %v7261_v46 = vld [vmem:[#allocation11_spill] sm:$0xff] }
 0x2cd   : > { %v4828_v22 = vpop.eup %4827  ;;  %2918 = vst [vmem:[%s6819_s7 + $0x18] sm:$0xff] %v2902_v52  ;;  %v2808_v18 = vmul.f32 %v4826_v16, %v6795_v63  ;;  %v3254_v58 = vmul.f32 -1.442695, %v6841_v0  ;;  %v4532_v51 = vadd.f32 %v4172_v62, %v6765_v61  ;;  %v2649_v43 = vpop.f32.mrb[13].mxu1  ;;  %v7262_v52 = vld [vmem:[#allocation10_spill] sm:$0xff] }
 0x2ce   : > { %2917 = vst [vmem:[%s6819_s7 + $0x10] sm:$0xff] %v2901_v8  ;;  %v2807_v57 = vmul.f32 %v4828_v22, %v6798_v39  ;;  %v3253_v47 = vmul.f32 -1.442695, %v6845_v45  ;;  %v4533_v42 = vadd.f32 %v2649_v43, %v6767_v60 }
 0x2cf   : > { %v2904_v12 = vadd.f32 %v7257_v15, %v2808_v18  ;;  %4837 = vpow2.f32 %v3254_v58  ;;  %v6857_v36 = vadd.f32 %v4532_v51, %v6776_v3  ;;  %v7264_v18 = vld [vmem:[#allocation12_spill] sm:$0xff]  ;;  %v7266_v15 = vld [vmem:[#allocation14_spill] sm:$0xff] }
 0x2d0   : > { %v4830_v63 = vpop.eup %4829  ;;  %v2903_v55 = vadd.f32 %v7258_v34, %v2807_v57  ;;  %4839 = vpow2.f32 %v3253_v47  ;;  %v6861_v61 = vadd.f32 %v4533_v42, %v6776_v3  ;;  %v4175_v4 = vpop.f32.mrb[14].mxu1  ;;  %v7267_v34 = vld [vmem:[#allocation17_spill] sm:$0xff] }
 0x2d1   : > { %2920 = vst [vmem:[%s6819_s7 + $0x28] sm:$0xff] %v2904_v12  ;;  %v2810_v39 = vmul.f32 %v4830_v63, %v6805_v25  ;;  %v3256_v60 = vmul.f32 -1.442695, %v6857_v36  ;;  %v4534_v1 = vadd.f32 %v4175_v4, %v6769_v5  ;;  %v2659_v38 = vpop.f32.mrb[15].mxu1 }
 0x2d2   : > { %2919 = vst [vmem:[%s6819_s7 + $0x20] sm:$0xff] %v2903_v55  ;;  %v3255_v31 = vmul.f32 -1.442695, %v6861_v61  ;;  %v4535_v26 = vadd.f32 %v2659_v38, %v6771_v20 }
 0x2d3   : > { %v4832_v44 = vpop.eup %4831  ;;  %v2906_v13 = vadd.f32 %v7259_v10, %v2810_v39  ;;  %4841 = vpow2.f32 %v3256_v60  ;;  %v2706_v27 = vadd.f32 %v4534_v1, %v6776_v3  ;;  %v7268_v39 = vld [vmem:[#allocation16_spill] sm:$0xff] }
 0x2d4   : > { %v2809_v40 = vmul.f32 %v4832_v44, %v6808_v11  ;;  %4843 = vpow2.f32 %v3255_v31  ;;  %v2705_v25 = vadd.f32 %v4535_v26, %v6776_v3 }
 0x2d5   : > { %v4834_v19 = vpop.eup %4833  ;;  %2922 = vst [vmem:[%s6819_s7 + $0x38] sm:$0xff] %v2906_v13  ;;  %v3258_v5 = vmul.f32 -1.442695, %v2706_v27 }
 0x2d6   : > { %v4836_v53 = vpop.eup %4835  ;;  %v2905_v28 = vadd.f32 %v7260_v59, %v2809_v40  ;;  %v2764_v32 = vadd.f32 1.0, %v4834_v19  ;;  %v3257_v20 = vmul.f32 -1.442695, %v2705_v25 }
 0x2d7   : > { %v2763_v9 = vadd.f32 1.0, %v4836_v53  ;;  %4845 = vpow2.f32 %v3258_v5 }
 0x2d8   : > { %2921 = vst [vmem:[%s6819_s7 + $0x30] sm:$0xff] %v2905_v28  ;;  %4847 = vrcp.f32 %v2764_v32 }
 0x2d9   : > { %v4838_v49 = vpop.eup %4837  ;;  %4849 = vrcp.f32 %v2763_v9 }
 0x2da   : > { %v4840_v30 = vpop.eup %4839  ;;  %v2766_v50 = vadd.f32 1.0, %v4838_v49  ;;  %4851 = vpow2.f32 %v3257_v20 }
 0x2db   : > { %v2765_v11 = vadd.f32 1.0, %v4840_v30 }
 0x2dc   : > { %4853 = vrcp.f32 %v2766_v50 }
 0x2dd   : > { %v4842_v3 = vpop.eup %4841  ;;  %4855 = vrcp.f32 %v2765_v11 }
 0x2de   : > { %v4844_v33 = vpop.eup %4843  ;;  %v2768_v56 = vadd.f32 1.0, %v4842_v3 }
 0x2df   : > { %v2767_v29 = vadd.f32 1.0, %v4844_v33 }
 0x2e0   : > { %4857 = vrcp.f32 %v2768_v56 }
 0x2e1   : > { %v4846_v37 = vpop.eup %4845  ;;  %4859 = vrcp.f32 %v2767_v29 }
 0x2e2   : > { %v4848_v41 = vpop.eup %4847  ;;  %v2770_v35 = vadd.f32 1.0, %v4846_v37 }
 0x2e3   : > { %v4850_v2 = vpop.eup %4849  ;;  %v2812_v54 = vmul.f32 %v4848_v41, %v6825_v48 }
 0x2e4   : > { %v4852_v24 = vpop.eup %4851  ;;  %v2811_v14 = vmul.f32 %v4850_v2, %v6829_v17  ;;  %4861 = vrcp.f32 %v2770_v35  ;;  %v7263_v17 = vld [vmem:[#allocation13_spill] sm:$0xff] }
 0x2e5   : > { %v2908_v6 = vadd.f32 %v7261_v46, %v2812_v54  ;;  %v2769_v21 = vadd.f32 1.0, %v4852_v24 }
 0x2e6   : > { %v4854_v7 = vpop.eup %4853  ;;  %v2907_v16 = vadd.f32 %v7262_v52, %v2811_v14 }
 0x2e7   : > { %v4856_v23 = vpop.eup %4855  ;;  %2924 = vst [vmem:[%s6819_s7 + $0x48] sm:$0xff] %v2908_v6  ;;  %v2814_v8 = vmul.f32 %v4854_v7, %v6841_v0  ;;  %4863 = vrcp.f32 %v2769_v21  ;;  %v7265_v0 = vld [vmem:[#allocation15_spill] sm:$0xff] }
 0x2e8   : > { %2923 = vst [vmem:[%s6819_s7 + $0x40] sm:$0xff] %v2907_v16  ;;  %v2813_v48 = vmul.f32 %v4856_v23, %v6845_v45 }
 0x2e9   : > { %v2910_v62 = vadd.f32 %v7263_v17, %v2814_v8 }
 0x2ea   : > { %v4858_v22 = vpop.eup %4857  ;;  %v2909_v58 = vadd.f32 %v7264_v18, %v2813_v48 }
 0x2eb   : > { %v4860_v51 = vpop.eup %4859  ;;  %2926 = vst [vmem:[%s6819_s7 + $0x58] sm:$0xff] %v2910_v62  ;;  %v2816_v43 = vmul.f32 %v4858_v22, %v6857_v36 }
 0x2ec   : > { %2925 = vst [vmem:[%s6819_s7 + $0x50] sm:$0xff] %v2909_v58  ;;  %v2815_v57 = vmul.f32 %v4860_v51, %v6861_v61 }
 0x2ed   : > { %v2912_v47 = vadd.f32 %v7265_v0, %v2816_v43 }
 0x2ee   : > { %v4862_v42 = vpop.eup %4861  ;;  %v2911_v12 = vadd.f32 %v7266_v15, %v2815_v57 }
 0x2ef   : > { %2928 = vst [vmem:[%s6819_s7 + $0x68] sm:$0xff] %v2912_v47  ;;  %v2818_v45 = vmul.f32 %v4862_v42, %v2706_v27 }
 0x2f0   : > { %2927 = vst [vmem:[%s6819_s7 + $0x60] sm:$0xff] %v2911_v12 }
 0x2f1   : > { %v4864_v63 = vpop.eup %4863  ;;  %v2914_v55 = vadd.f32 %v7267_v34, %v2818_v45 }
 0x2f2   : > { %v2817_v4 = vmul.f32 %v4864_v63, %v2705_v25 }
 0x2f3   : > { %2930 = vst [vmem:[%s6819_s7 + $0x78] sm:$0xff] %v2914_v55 }
 0x2f4   : > { %v2913_v60 = vadd.f32 %v7268_v39, %v2817_v4 }
 0x2f6   : > { %2929 = vst [vmem:[%s6819_s7 + $0x70] sm:$0xff] %v2913_v60 }
 0x2f7 PF: > { %s15_s22 = sadd.s32 1, %s4903_s22   ;;  %s7269_s18 = smov %s4895_s20 }
 0x2f8   : > { %p12_p8 = scmp.ge.s32.totalorder %s15_s22, 6   ;;  %s7270_s19 = smov %s4899_s21 }
 0x2f9   : > { %s7271_s20 = smov %s7274_s23  ;;  %s7272_s21 = smov %s7278_s24 }
 0x2fa   :  { %14 = sbr.rel (!%p12_p8) target bundleno = 3 (0x3), region = 78 }

</bundles_post_ra>
